<compile_context>
chip_gen: v7x
topology: tpu7x:2x2x1
jax: 0.10.0
libtpu: 0.0.40
codegen_flags: <defaults>
</compile_context>

<pallas_src>
import functools
import math

import jax
import jax.numpy as jnp
from jax.experimental import pallas as pl
from jax.experimental.pallas import tpu as pltpu

LANE = 128
SUBLANE = 8
# Keep an operand resident in VMEM (instead of streaming per row tile) if its
# padded bf16 footprint is at most this many bytes.
RESIDENT_BYTES = 4 * 1024 * 1024


def _round_up(v, m):
    return ((v + m - 1) // m) * m


def _pad_to(a, shape):
    out = jnp.zeros(shape, a.dtype)
    return out.at[tuple(slice(0, s) for s in a.shape)].set(a)


# --------------------------------------------------------------------------
# Kernel 1: T = relu(A_hat @ (X W1) + b1) @ W2        (GCNConv1 + conv2 lin)
#   grid = (N/tm, N/tk); k is the reduction axis of the N x N aggregation.
# --------------------------------------------------------------------------
def conv1_kernel(adj_ref, xw1_ref, b1_ref, w2_ref, t_ref, acc_ref, *,
                 block_k, x_resident):
    k = pl.program_id(1)

    @pl.when(k == 0)
    def _():
        acc_ref[...] = jnp.zeros_like(acc_ref)

    if x_resident:
        row = pl.multiple_of(k * block_k, block_k)
        xw1 = xw1_ref[pl.ds(row, block_k), :]
    else:
        xw1 = xw1_ref[...]

    # Dominant matmul: bf16 x bf16 -> f32 accumulation of A_hat @ (X W1).
    acc_ref[...] += jnp.dot(adj_ref[...], xw1,
                            preferred_element_type=jnp.float32)

    @pl.when(k == pl.num_programs(1) - 1)
    def _():
        h = jnp.maximum(acc_ref[...] + b1_ref[...], 0.0)
        # Fuse GCNConv2's feature transform so the [N, H] hidden activation is
        # never written to HBM.
        t_ref[...] = jnp.dot(h.astype(w2_ref.dtype), w2_ref[...],
                             preferred_element_type=jnp.float32
                             ).astype(t_ref.dtype)


# --------------------------------------------------------------------------
# Kernel 2: pooled_partial[i] = pool[:, i-tile] @ A_hat[i-tile, :] @ T
#   grid = (N/tm, N/tk); k is a reduction, i is fully parallel (per-i output
#   block), so megacore sharding on v7x is allowed.
# --------------------------------------------------------------------------
def conv2_pool_kernel(pool_ref, adj_ref, t_ref, part_ref, *,
                      block_k, t_resident):
    k = pl.program_id(1)

    @pl.when(k == 0)
    def _():
        part_ref[...] = jnp.zeros_like(part_ref)

    if t_resident:
        row = pl.multiple_of(k * block_k, block_k)
        t = t_ref[pl.ds(row, block_k), :]
    else:
        t = t_ref[...]

    # Only the pooled graph-level result is needed, so contract with the tiny
    # pooling matrix FIRST: (pool @ adj) @ T costs ~2*G*tm*tk FLOPs per tile
    # instead of 2*tm*tk*128 for a materialized Z2 = A @ T.
    pa = jnp.dot(pool_ref[...], adj_ref[...],
                 preferred_element_type=jnp.float32)
    part_ref[...] += jnp.dot(pa.astype(t.dtype), t,
                             preferred_element_type=jnp.float32)[None]


# --------------------------------------------------------------------------
# Kernel 3: pooled = sum_i partial[i] + counts*b2 ; out = log_softmax(pooled)
#   Tiny (ni, G, C) -> (G, C) finalize; padded class lanes masked to -inf.
# --------------------------------------------------------------------------
def finalize_kernel(part_ref, bias_ref, out_ref, *, num_classes):
    pooled = jnp.sum(part_ref[...], axis=0) + bias_ref[...]
    lane = jax.lax.broadcasted_iota(jnp.int32, pooled.shape, dimension=1)
    valid = lane < num_classes
    masked = jnp.where(valid, pooled, -jnp.inf)
    m = jnp.max(masked, axis=-1, keepdims=True)
    z = masked - m
    lse = jnp.log(jnp.sum(jnp.exp(z), axis=-1, keepdims=True))
    out_ref[...] = jnp.where(valid, z - lse, 0.0).astype(out_ref.dtype)


# --------------------------------------------------------------------------
# Padded-input construction (shared by the Pallas path and the matched ref).
# --------------------------------------------------------------------------
def build_normalized_adjacency_padded(edge_index, num_nodes, padded_n,
                                      dtype=jnp.bfloat16):
    """D^-1/2 (A + I) D^-1/2 built directly at the padded size (zero pad)."""
    src = edge_index[0]
    dst = edge_index[1]
    loops = jnp.arange(num_nodes, dtype=edge_index.dtype)
    src = jnp.concatenate([src, loops])
    dst = jnp.concatenate([dst, loops])
    a = jnp.zeros((padded_n, padded_n), jnp.float32)
    # message passing: out[i] = sum over edges (j -> i) of x[j] => A[dst, src]=1
    a = a.at[dst, src].add(1.0)
    deg = a.sum(axis=1)
    dinv = jnp.where(deg > 0, jax.lax.rsqrt(deg), 0.0)
    return (dinv[:, None] * a * dinv[None, :]).astype(dtype)


def build_pool_matrix_padded(batch, num_graphs, gp, padded_n,
                             dtype=jnp.bfloat16):
    n = batch.shape[0]
    sel = (jnp.arange(gp, dtype=batch.dtype)[:, None]
           == batch[None, :]).astype(jnp.float32)
    pool = jnp.zeros((gp, padded_n), jnp.float32).at[:, :n].set(sel)
    return pool.astype(dtype)


def _prepare_padded_inputs(x, edge_index, batch, w1, b1, w2, b2, num_graphs,
                           tm, tk, num_nodes_padded):
    n = x.shape[0]
    hid = w1.shape[1]
    n_cls = w2.shape[1]

    hp = _round_up(hid, LANE)
    cp = _round_up(n_cls, LANE)
    gp = _round_up(num_graphs, SUBLANE)

    tile = math.lcm(tm, tk)
    np_ = _round_up(n, tile)
    if num_nodes_padded is not None:
        np_ = max(np_, _round_up(num_nodes_padded, tile))

    f32 = jnp.float32
    bf16 = jnp.bfloat16

    adj_p = build_normalized_adjacency_padded(edge_index, n, np_, bf16)
    pool_p = build_pool_matrix_padded(batch, num_graphs, gp, np_, bf16)

    # Hoist the tiny X @ W1 (N x 3 @ 3 x 16) out of kernel 1.
    xw1 = x.astype(f32) @ w1.astype(f32)
    xw1_p = _pad_to(xw1, (np_, hp)).astype(bf16)

    b1_p = _pad_to(b1.reshape(1, -1).astype(f32), (1, hp))
    w2_p = _pad_to(w2.astype(f32), (hp, cp)).astype(bf16)

    # P @ (1 b2^T) = per-graph node count times the conv2 bias.
    counts = jnp.zeros((gp,), f32).at[batch].add(1.0)
    bias_p = counts[:, None] * _pad_to(b2.reshape(1, -1).astype(f32), (1, cp))

    return dict(adj=adj_p, xw1=xw1_p, b1=b1_p, w2=w2_p, pool=pool_p,
                bias=bias_p, np_=np_, hp=hp, cp=cp, gp=gp, n_cls=n_cls)


# --------------------------------------------------------------------------
# Pallas forward pass.
# --------------------------------------------------------------------------
def gcn_forward(x, edge_index, batch, w1, b1, w2, b2, num_graphs, *,
                tm=512, tk=512, num_nodes_padded=None):
    assert tm % SUBLANE == 0, "row tile must be a sublane multiple"
    assert tk % LANE == 0, "reduction tile must be a lane multiple"

    p = _prepare_padded_inputs(x, edge_index, batch, w1, b1, w2, b2,
                               num_graphs, tm, tk, num_nodes_padded)
    np_, hp, cp, gp = p["np_"], p["hp"], p["cp"], p["gp"]
    n_cls = p["n_cls"]

    grid = (np_ // tm, np_ // tk)
    ni = grid[0]

    x_resident = np_ * hp * 2 <= RESIDENT_BYTES
    t_resident = np_ * cp * 2 <= RESIDENT_BYTES

    vmem_limit = 32 * 1024 * 1024  # safe on v5e/v6e (128 MiB) and v7x (64 MiB)

    # ---- kernel 1: T = relu(A_hat @ (X W1) + b1) @ W2 ----
    xw1_spec = (pl.BlockSpec((np_, hp), lambda i, k: (0, 0)) if x_resident
                else pl.BlockSpec((tk, hp), lambda i, k: (k, 0)))
    t = pl.pallas_call(
        functools.partial(conv1_kernel, block_k=tk, x_resident=x_resident),
        out_shape=jax.ShapeDtypeStruct((np_, cp), jnp.bfloat16),
        grid_spec=pltpu.PrefetchScalarGridSpec(
            num_scalar_prefetch=0,
            grid=grid,
            in_specs=[
                pl.BlockSpec((tm, tk), lambda i, k: (i, k)),   # adj tile
                xw1_spec,                                      # X@W1 (resident or rows)
                pl.BlockSpec((1, hp), lambda i, k: (0, 0)),    # b1
                pl.BlockSpec((hp, cp), lambda i, k: (0, 0)),   # W2 (whole)
            ],
            out_specs=pl.BlockSpec((tm, cp), lambda i, k: (i, 0)),
            scratch_shapes=[pltpu.VMEM((tm, hp), jnp.float32)],
        ),
        compiler_params=pltpu.CompilerParams(
            dimension_semantics=("parallel", "arbitrary"),
            vmem_limit_bytes=vmem_limit,
        ),
        cost_estimate=pl.CostEstimate(
            flops=2 * np_ * np_ * hp + 2 * np_ * hp * cp,
            transcendentals=0,
            bytes_accessed=(2 * np_ * np_                                  # adj
                            + 2 * np_ * hp * (1 if x_resident else ni)     # X@W1
                            + 2 * hp * cp + 4 * hp                         # W2, b1
                            + 2 * np_ * cp),                               # T out
        ),
    )(p["adj"], p["xw1"], p["b1"], p["w2"])

    # ---- kernel 2: per-row-tile pooled partials (pool @ A_hat @ T) ----
    t_spec = (pl.BlockSpec((np_, cp), lambda i, k: (0, 0)) if t_resident
              else pl.BlockSpec((tk, cp), lambda i, k: (k, 0)))
    partials = pl.pallas_call(
        functools.partial(conv2_pool_kernel, block_k=tk, t_resident=t_resident),
        out_shape=jax.ShapeDtypeStruct((ni, gp, cp), jnp.float32),
        grid_spec=pltpu.PrefetchScalarGridSpec(
            num_scalar_prefetch=0,
            grid=grid,
            in_specs=[
                pl.BlockSpec((gp, tm), lambda i, k: (0, i)),   # pool cols of tile i
                pl.BlockSpec((tm, tk), lambda i, k: (i, k)),   # adj tile
                t_spec,                                        # T (resident or rows)
            ],
            out_specs=pl.BlockSpec((1, gp, cp), lambda i, k: (i, 0, 0)),
        ),
        compiler_params=pltpu.CompilerParams(
            # i axis is fully parallel now -> megacore sharding on v7x.
            dimension_semantics=("parallel", "arbitrary"),
            vmem_limit_bytes=vmem_limit,
        ),
        cost_estimate=pl.CostEstimate(
            flops=2 * gp * np_ * np_ + 2 * gp * np_ * cp,
            transcendentals=0,
            bytes_accessed=(2 * np_ * np_                                  # adj
                            + 2 * gp * np_                                 # pool
                            + 2 * np_ * cp * (1 if t_resident else ni)     # T
                            + 4 * ni * gp * cp),                           # partials
        ),
    )(p["pool"], p["adj"], t)

    # ---- kernel 3: sum partials + bias, masked log_softmax ----
    out_p = pl.pallas_call(
        functools.partial(finalize_kernel, num_classes=n_cls),
        out_shape=jax.ShapeDtypeStruct((gp, cp), jnp.float32),
        grid_spec=pltpu.PrefetchScalarGridSpec(
            num_scalar_prefetch=0,
            grid=(1,),
            in_specs=[
                pl.BlockSpec((ni, gp, cp), lambda i: (0, 0, 0)),
                pl.BlockSpec((gp, cp), lambda i: (0, 0)),
            ],
            out_specs=pl.BlockSpec((gp, cp), lambda i: (0, 0)),
        ),
        compiler_params=pltpu.CompilerParams(
            dimension_semantics=("arbitrary",),
        ),
    )(partials, p["bias"])

    return out_p[:num_graphs, :n_cls]


# --------------------------------------------------------------------------
# References: (a) bf16-matched (same casts as the kernels), (b) pure f32.
# --------------------------------------------------------------------------
def gcn_forward_bf16_ref(x, edge_index, batch, w1, b1, w2, b2, num_graphs, *,
                         tm=512, tk=512, num_nodes_padded=None):
    p = _prepare_padded_inputs(x, edge_index, batch, w1, b1, w2, b2,
                               num_graphs, tm, tk, num_nodes_padded)
    f32, bf16 = jnp.float32, jnp.bfloat16
    acc = jnp.dot(p["adj"], p["xw1"], preferred_element_type=f32)
    h = jnp.maximum(acc + p["b1"], 0.0)
    t = jnp.dot(h.astype(bf16), p["w2"],
                preferred_element_type=f32).astype(bf16)
    pa = jnp.dot(p["pool"], p["adj"], preferred_element_type=f32)
    pooled = jnp.dot(pa.astype(bf16), t, preferred_element_type=f32) + p["bias"]
    out = jax.nn.log_softmax(pooled[:, :p["n_cls"]], axis=-1)
    return out[:num_graphs]


def gcn_forward_f32_ref(x, edge_index, batch, w1, b1, w2, b2, num_graphs):
    n = x.shape[0]
    adj = build_normalized_adjacency_padded(edge_index, n, n, jnp.float32)
    pool = (batch[None, :] == jnp.arange(num_graphs)[:, None]).astype(jnp.float32)
    h = jnp.maximum(adj @ (x @ w1) + b1[None, :], 0.0)
    z2 = adj @ (h @ w2) + b2[None, :]
    pooled = pool @ z2
    return jax.nn.log_softmax(pooled, axis=-1)


if __name__ == "__main__":
    key = jax.random.PRNGKey(0)
    k_x, k_w1, k_b1, k_w2, k_b2 = jax.random.split(key, 5)

    # Graph data (mirrors the PyTorch test fixture)
    batch = jnp.array([0, 0, 0, 1, 1, 2, 2, 2], dtype=jnp.int32)
    edge_index = jnp.array(
        [[0, 1, 1, 2, 2, 3, 3, 4, 4, 5, 5, 6, 6, 7],
         [1, 0, 2, 1, 3, 2, 4, 3, 5, 4, 6, 5, 7, 6]], dtype=jnp.int32)
    num_nodes, num_graphs = 8, 3

    x = jax.random.normal(k_x, (num_nodes, 3), dtype=jnp.float32)

    # Deterministic parameter init (GCNConv(3, 16), GCNConv(16, 7))
    in1, hid, out_c = 3, 16, 7
    w1 = jax.random.normal(k_w1, (in1, hid), jnp.float32) / jnp.sqrt(in1)
    b1 = 0.1 * jax.random.normal(k_b1, (hid,), jnp.float32)
    w2 = jax.random.normal(k_w2, (hid, out_c), jnp.float32) / jnp.sqrt(hid)
    b2 = 0.1 * jax.random.normal(k_b2, (out_c,), jnp.float32)

    # num_nodes_padded=1024 with 512-wide tiles exercises a real (2, 2) grid
    # (multi-step row tiles + k reduction + per-i pooled partials) even at this
    # toy size; padded rows/cols are exact zeros so the reference check holds.
    out = gcn_forward(x, edge_index, batch, w1, b1, w2, b2, num_graphs,
                      tm=512, tk=512, num_nodes_padded=1024)
    jax.block_until_ready(out)
    assert out.shape == (num_graphs, out_c)

    # Tight check against a reference with the same bf16 casts / f32 accumulation.
    ref_bf16 = gcn_forward_bf16_ref(x, edge_index, batch, w1, b1, w2, b2,
                                    num_graphs, tm=512, tk=512,
                                    num_nodes_padded=1024)
    assert jnp.allclose(out, ref_bf16, atol=2e-2, rtol=2e-2), (out, ref_bf16)

    # Loose sanity check against the pure-f32 reference (bf16 quantization only).
    ref_f32 = gcn_forward_f32_ref(x, edge_index, batch, w1, b1, w2, b2,
                                  num_graphs)
    assert jnp.allclose(out, ref_f32, atol=2e-1, rtol=1e-1), (out, ref_f32)

    print("KERNEL_OK")
</pallas_src>

<mosaic_0001>
module attributes {stable_mosaic.version = 11 : i64} {
  func.func @conv1_kernel(%arg0: i32, %arg1: i32, %arg2: memref<512x512xbf16, #tpu.memory_space<vmem>>, %arg3: memref<1024x128xbf16, #tpu.memory_space<vmem>>, %arg4: memref<1x128xf32, #tpu.memory_space<vmem>>, %arg5: memref<128x128xbf16, #tpu.memory_space<vmem>>, %arg6: memref<512x128xbf16, #tpu.memory_space<vmem>>, %arg7: memref<512x128xf32, #tpu.memory_space<vmem>>) attributes {dimension_semantics = [#tpu.dimension_semantics<parallel>, #tpu.dimension_semantics<arbitrary>], iteration_bounds = array<i64: 2, 2>, scalar_prefetch = 0 : i64, scratch_operands = 1 : i64, tpu.core_type = #tpu.core_type<tc>, window_params = [{transform_indices = @transform_0, window_bounds = array<i64: 512, 512>}, {pipeline_mode = #tpu.pipeline_mode<synchronous>, transform_indices = @transform_1, window_bounds = array<i64: 1024, 128>}, {pipeline_mode = #tpu.pipeline_mode<synchronous>, transform_indices = @transform_2, window_bounds = array<i64: 1, 128>}, {pipeline_mode = #tpu.pipeline_mode<synchronous>, transform_indices = @transform_3, window_bounds = array<i64: 128, 128>}, {transform_indices = @transform_4, window_bounds = array<i64: 512, 128>}]} {
    %c0_i32 = arith.constant 0 : i32
    %0 = arith.cmpi eq, %arg1, %c0_i32 : i32
    %1 = arith.extui %0 : i1 to i32
    %c0_i32_0 = arith.constant 0 : i32
    %2 = arith.cmpi ne, %1, %c0_i32_0 : i32
    scf.if %2 {
      %cst_8 = arith.constant 0.000000e+00 : f32
      %15 = vector.broadcast %cst_8 : f32 to vector<512x128xf32>
      %c0_9 = arith.constant 0 : index
      %c0_10 = arith.constant 0 : index
      %16 = vector.load %arg7[%c0_9, %c0_10] : memref<512x128xf32, #tpu.memory_space<vmem>>, vector<512x128xf32>
      tpu.vector_store %arg7[%c0_9, %c0_10], %15 {strides = array<i32>} : memref<512x128xf32, #tpu.memory_space<vmem>>, vector<512x128xf32>,
    } else {
    }
    %c512_i32 = arith.constant 512 : i32
    %3 = arith.muli %arg1, %c512_i32 : i32
    %4 = tpu.assume_multiple %3, 512 : i32
    %5 = arith.index_cast %4 : i32 to index
    %c0 = arith.constant 0 : index
    %6 = vector.load %arg3[%5, %c0] : memref<1024x128xbf16, #tpu.memory_space<vmem>>, vector<512x128xbf16>
    %c0_1 = arith.constant 0 : index
    %c0_2 = arith.constant 0 : index
    %7 = vector.load %arg7[%c0_1, %c0_2] : memref<512x128xf32, #tpu.memory_space<vmem>>, vector<512x128xf32>
    %c0_3 = arith.constant 0 : index
    %c0_4 = arith.constant 0 : index
    %8 = vector.load %arg2[%c0_3, %c0_4] : memref<512x512xbf16, #tpu.memory_space<vmem>>, vector<512x512xbf16>
    %cst = arith.constant dense<0.000000e+00> : vector<512x128xf32>
    %9 = tpu.matmul %8, %6, %cst {dimension_numbers = #tpu.dot_dimension_numbers<[1], [0], [0], [1], [0, 0, 1, 1], [], []>} : vector<512x512xbf16>, vector<512x128xbf16>, vector<512x128xf32> -> vector<512x128xf32>
    %10 = arith.addf %7, %9 : vector<512x128xf32>
    %c0_5 = arith.constant 0 : index
    %c0_6 = arith.constant 0 : index
    %11 = vector.load %arg7[%c0_5, %c0_6] : memref<512x128xf32, #tpu.memory_space<vmem>>, vector<512x128xf32>
    tpu.vector_store %arg7[%c0_5, %c0_6], %10 {strides = array<i32>} : memref<512x128xf32, #tpu.memory_space<vmem>>, vector<512x128xf32>,
    %c1_i32 = arith.constant 1 : i32
    %12 = arith.cmpi eq, %arg1, %c1_i32 : i32
    %13 = arith.extui %12 : i1 to i32
    %c0_i32_7 = arith.constant 0 : i32
    %14 = arith.cmpi ne, %13, %c0_i32_7 : i32
    scf.if %14 {
      %c0_8 = arith.constant 0 : index
      %c0_9 = arith.constant 0 : index
      %15 = vector.load %arg7[%c0_8, %c0_9] : memref<512x128xf32, #tpu.memory_space<vmem>>, vector<512x128xf32>
      %c0_10 = arith.constant 0 : index
      %c0_11 = arith.constant 0 : index
      %16 = vector.load %arg4[%c0_10, %c0_11] : memref<1x128xf32, #tpu.memory_space<vmem>>, vector<1x128xf32>
      %17 = vector.broadcast %16 : vector<1x128xf32> to vector<512x128xf32>
      %18 = arith.addf %15, %17 : vector<512x128xf32>
      %cst_12 = arith.constant 0.000000e+00 : f32
      %19 = vector.broadcast %cst_12 : f32 to vector<512x128xf32>
      %20 = arith.maximumf %18, %19 : vector<512x128xf32>
      %21 = arith.truncf %20 : vector<512x128xf32> to vector<512x128xbf16>
      %c0_13 = arith.constant 0 : index
      %c0_14 = arith.constant 0 : index
      %22 = vector.load %arg5[%c0_13, %c0_14] : memref<128x128xbf16, #tpu.memory_space<vmem>>, vector<128x128xbf16>
      %cst_15 = arith.constant dense<0.000000e+00> : vector<512x128xf32>
      %23 = tpu.matmul %21, %22, %cst_15 {dimension_numbers = #tpu.dot_dimension_numbers<[1], [0], [0], [1], [0, 0, 1, 1], [], []>} : vector<512x128xbf16>, vector<128x128xbf16>, vector<512x128xf32> -> vector<512x128xf32>
      %24 = arith.truncf %23 : vector<512x128xf32> to vector<512x128xbf16>
      %c0_16 = arith.constant 0 : index
      %c0_17 = arith.constant 0 : index
      %25 = vector.load %arg6[%c0_16, %c0_17] : memref<512x128xbf16, #tpu.memory_space<vmem>>, vector<512x128xbf16>
      tpu.vector_store %arg6[%c0_16, %c0_17], %24 {strides = array<i32>} : memref<512x128xbf16, #tpu.memory_space<vmem>>, vector<512x128xbf16>,
    } else {
    }
    return
  }
  func.func @transform_0(%arg0: i32, %arg1: i32) -> (i32, i32) {
    %c0_i32 = arith.constant 0 : i32
    return %arg0, %arg1 : i32, i32
  }
  func.func @transform_1(%arg0: i32, %arg1: i32) -> (i32, i32) {
    %c0_i32 = arith.constant 0 : i32
    %c0_i32_0 = arith.constant 0 : i32
    %c0_i32_1 = arith.constant 0 : i32
    return %c0_i32, %c0_i32_0 : i32, i32
  }
  func.func @transform_2(%arg0: i32, %arg1: i32) -> (i32, i32) {
    %c0_i32 = arith.constant 0 : i32
    %c0_i32_0 = arith.constant 0 : i32
    %c0_i32_1 = arith.constant 0 : i32
    return %c0_i32, %c0_i32_0 : i32, i32
  }
  func.func @transform_3(%arg0: i32, %arg1: i32) -> (i32, i32) {
    %c0_i32 = arith.constant 0 : i32
    %c0_i32_0 = arith.constant 0 : i32
    %c0_i32_1 = arith.constant 0 : i32
    return %c0_i32, %c0_i32_0 : i32, i32
  }
  func.func @transform_4(%arg0: i32, %arg1: i32) -> (i32, i32) {
    %c0_i32 = arith.constant 0 : i32
    %c0_i32_0 = arith.constant 0 : i32
    return %arg0, %c0_i32 : i32, i32
  }
}

</mosaic_0001>

<bundles_post_ra>
// kernel: tpu_custom_call.1
= control target key start
LH: loop header
LB: loop body
LE: loop exit
PB: predicated region body
PF: predicated region fallthrough
CT: control target
= control target key end

     0   :  { %s5199_s0 = inlined_call_operand.hbm [shape: bf16[1024,1024], index: 0, kind: input, shape index: {}]   ;;  %s5200_s1 = inlined_call_operand.hbm [shape: bf16[1024,128], index: 1, kind: input, shape index: {}]   ;;  %s5201_s2 = inlined_call_operand.hbm [shape: f32[1,128], index: 2, kind: input, shape index: {}]   ;;  %s5202_s3 = inlined_call_operand.hbm [shape: bf16[128,128], index: 3, kind: input, shape index: {}]   ;;  %s5203_s4 = inlined_call_operand.hbm [shape: bf16[1024,128], index: 4, kind: output, shape index: {}]  }
   0x1   :  { %5218 = sst [smem:[#allocation20_spill]] %s5200_s1 }
   0x2   :  { %5219 = sst [smem:[#allocation21_spill]] %s5201_s2 }
   0x3   :  { %5220 = sst [smem:[#allocation22_spill]] %s5203_s4 }
   0x4   :  { %9 = vsyncpa [#allocation4], 0 }
   0x5   :  { %11 = vsyncpa [#allocation4 + $0x1], 0 }
   0x6   :  { %12 = vsyncpa [#allocation7], 0 }
   0x7   :  { %13 = vsyncpa [#allocation10], 0 }
   0x8   :  { %14 = vsyncpa [#allocation5], 0 }
   0x9   :  { %16 = vsyncpa [#allocation5 + $0x1], 0  ;;  %s4498_s15 = smov 0   ;;  %s4500_s16 = smov 0  }
   0xa   :  { %s4502_s17 = smov 0   ;;  %s4504_s18 = smov 0  }
   0xb   :  { %s4506_s19 = smov 0   ;;  %s4508_s20 = smov 0  }
   0xc   :  { %s4510_s21 = smov 0   ;;  %s4512_s22 = smov 0  }
   0xd   :  { %s4514_s23 = smov 0   ;;  %s4516_s24 = smov 0  }
   0xe   :  { %s4518_s25 = smov 0  }
   0xf LB: > { %5221 = sst [smem:[#allocation16_spill]] %s4417_s15  ;;  %s3186_s26 = sadd.s32 4294967295, %s4457_s25   ;;  %s4457_s25 = sphi %s4518_s25, %s22_s25   ;;  %s4453_s24 = sphi %s4516_s24, %s5259_s24   ;;  %s4449_s23 = sphi %s4514_s23, %s5258_s23   ;;  %s4445_s22 = sphi %s4512_s22, %s5257_s22   ;;  %s4441_s21 = sphi %s4510_s21, %s5256_s21   ;;  %s4437_s20 = sphi %s4508_s20, %s5255_s20   ;;  %s4433_s19 = sphi %s4506_s19, %s5254_s19   ;;  %s4429_s18 = sphi %s4504_s18, %s5253_s18   ;;  %s4425_s17 = sphi %s4502_s17, %s5252_s17   ;;  %s4421_s16 = sphi %s4500_s16, %s5251_s16   ;;  %s4417_s15 = sphi %s4498_s15, %s5250_s15  }
  0x10   : > { %5222 = sst [smem:[#allocation17_spill]] %s4457_s25  ;;  %s3187_s27 = sadd.s32 4294967294, %s4457_s25  }
  0x11   : > { %p50_p0 = scmp.ne.s32.totalorder %s4437_s20, %s4433_s19  ;;  %p51_p1 = scmp.eq.s32.totalorder %s4457_s25, 0 }
  0x12   : > { %p56_p2 = scmp.ne.s32.totalorder %s4433_s19, %s4429_s18  ;;  %p4558_p3 = scmp.eq.s32.totalorder %s3186_s26, 0 }
  0x13   : > { %p4563_p4 = por %p51_p1, %p50_p0  ;;  %p142_p5 = scmp.ne.s32.totalorder %s4425_s17, %s4421_s16 }
  0x14   : > { %s5223_s29 = scalar_select %p4558_p3, 1, 0 }
  0x15   : > { %p4571_p6 = por %p4558_p3, %p56_p2  ;;  %p143_p7 = scmp.eq.s32.totalorder %s3186_s26, 3 }
  0x16   : > { %p148_p8 = scmp.ne.s32.totalorder %s4421_s16, %s4417_s15  ;;  %p149_p9 = scmp.eq.s32.totalorder %s3187_s27, 3 }
  0x17   : > { %s5225_s6 = scalar_select %p4571_p6, 1, 0 }
  0x18   : > { %p4577_p10 = por %p143_p7, %p142_p5  ;;  %p3188_p11 = scmp.ge.s32.totalorder %s4457_s25, 1 }
  0x19   : > { %p4582_p12 = por %p149_p9, %p148_p8  ;;  %p156_p13 = scmp.lt.s32.totalorder %s4457_s25, 5 }
  0x1a   : > { %s5226_s7 = scalar_select %p4577_p10, 1, 0 }
  0x1b   : > { %s5228_s8 = scalar_select %p4582_p12, 1, 0 }
  0x1c   : > { %5227 = sst [smem:[#allocation18_spill]] %s5226_s7  ;;  %p4587_p0 = pnand %p3188_p11, %p156_p13 }
  0x1d   : > { %5229 = sst [smem:[#allocation19_spill]] %s5228_s8  ;;  %s4459_s10 = smov [#allocation6]  }
  0x1e   : > { %s5230_s9 = scalar_select %p4587_p0, 1, 0 }
  0x1f   : > { %s168_s11 = sshll.u32 %s4459_s10, 4  ;;  %p3855_p1 = pneg %p4587_p0  ;;  %s4591_s11 = int_to_ptr.vmem [resolvable:$true] %s168_s11 }
  0x20   : > { %p3876_p2 = scmp.lt.s32.totalorder %s4457_s25, 4  ;;  %s4460_s14 = smov [#allocation8]  }
  0x21   : > { %p4598_p5 = pnand %p3855_p1, %p4558_p3  ;;  %s182_s18 = sshll.u32 %s4460_s14, 4  ;;  %s4608_s18 = int_to_ptr.vmem [resolvable:$true] %s182_s18 }
  0x22   : > { %p4604_p7 = pnand %p3876_p2, %p4563_p4  ;;  %s5233_s1 = sld [smem:[#allocation20_spill]] }
  0x23   : > { %p4618_p9 = pneg %p4598_p5 }
  0x24   : > { %s5232_s13 = scalar_select %p4604_p7, 1, 0 }
  0x28   : > { %s4213_s10 = scalar_lea.hbm %s5233_s1, 8192 }
  0x29   : > { %p4214_p8 = scmp.ne.s32.totalorder %s5233_s1, %s4213_s10  ;;  %p4220_p13 = scmp.lt.u32.totalorder %s4213_s10, %s5233_s1 }
  0x2b   : > { %p4216_p4 = pnand %p4618_p9, %p4214_p8 }
  0x2d   : > { %p4217_p11 = pneg %p4216_p4 }
  0x2f   : > { %p4222_p1 = pnand %p4220_p13, %p4217_p11 }
  0x31   : > { %4225 = shalt.err (!%p4222_p1)
}
  0x32   : > { %s4226_s28 = scalar_lea.vmem %s4591_s11, 8192  ;;  %p4234_p3 = scmp.lt.s32.totalorder %s4591_s11, %s4591_s11 }
  0x33   : > { %p4227_p2 = scmp.ne.s32.totalorder %s4591_s11, %s4226_s28  ;;  %p4235_p6 = scmp.lt.s32.totalorder %s4226_s28, %s4226_s28 }
  0x35   : > { %p4229_p12 = pnand %p4227_p2, %p4618_p9  ;;  %p4236_p8 = por %p4235_p6, %p4234_p3 }
  0x37   : > { %p4230_p10 = pneg %p4229_p12 }
  0x39   : > { %p4237_p4 = pnand %p4236_p8, %p4230_p10 }
  0x3b   : > { %4240 = shalt.err (!%p4237_p4)
}
  0x3c   : > { %s5215_s30 = smov 64   ;;  %s4462_s8 = smov 4  }
  0x3d   : > { %3858 = dma.hbm_to_vmem [thread:$0]  (!%p4598_p5), %s5233_s1, 8192, %s4591_s11, [#allocation7], %s5215_s30, %s5215_s30, %s4462_s8  }
  0x3e   : > { %s5235_s2 = sld [smem:[#allocation21_spill]] }
  0x44   : > { %s4241_s28 = scalar_lea.hbm %s5235_s2, 16 }
  0x45   : > { %p4242_p3 = scmp.ne.s32.totalorder %s5235_s2, %s4241_s28  ;;  %p4248_p12 = scmp.lt.u32.totalorder %s4241_s28, %s5235_s2 }
  0x47   : > { %p4244_p6 = pnand %p4242_p3, %p4618_p9 }
  0x49   : > { %p4245_p10 = pneg %p4244_p6 }
  0x4b   : > { %p4250_p11 = pnand %p4248_p12, %p4245_p10 }
  0x4d   : > { %4253 = shalt.err (!%p4250_p11)
}
  0x4e   : > { %s4254_s11 = scalar_lea.vmem %s4608_s18, 16  ;;  %s4261_s15 = scalar_lea.vmem %s4608_s18, 32 }
  0x4f   : > { %p4255_p13 = scmp.ne.s32.totalorder %s4608_s18, %s4254_s11  ;;  %p4262_p8 = scmp.lt.s32.totalorder %s4608_s18, %s4608_s18 }
  0x50   : > { %p4263_p4 = scmp.lt.s32.totalorder %s4261_s15, %s4254_s11 }
  0x51   : > { %p4257_p1 = pnand %p4255_p13, %p4618_p9 }
  0x52   : > { %p4264_p3 = por %p4263_p4, %p4262_p8 }
  0x53   : > { %p4258_p2 = pneg %p4257_p1 }
  0x55   : > { %p4265_p6 = pnand %p4264_p3, %p4258_p2 }
  0x57   : > { %4268 = shalt.err (!%p4265_p6)
}
  0x58   : > { %3861 = dma.hbm_to_vmem [thread:$0]  (!%p4598_p5), %s5235_s2, 16, %s4608_s18, [#allocation7]  }
  0x59   : > { %s4463_s7 = smov [#allocation9]   ;;  %s4269_s14 = scalar_lea.hbm %s5202_s3, 1024 }
  0x5a   : > { %s192_s26 = sshll.u32 %s4463_s7, 4  ;;  %p4270_p10 = scmp.ne.s32.totalorder %s5202_s3, %s4269_s14  ;;  %s193_s26 = int_to_ptr.vmem [resolvable:$true] %s192_s26 }
  0x5b   : > { %p4276_p13 = scmp.lt.u32.totalorder %s4269_s14, %s5202_s3 }
  0x5c   : > { %p4272_p12 = pnand %p4270_p10, %p4618_p9 }
  0x5e   : > { %p4273_p11 = pneg %p4272_p12 }
  0x60   : > { %p4278_p1 = pnand %p4276_p13, %p4273_p11 }
  0x62   : > { %4281 = shalt.err (!%p4278_p1)
}
  0x63   : > { %s4282_s18 = scalar_lea.vmem %s193_s26, 1024  ;;  %p4290_p3 = scmp.lt.s32.totalorder %s193_s26, %s193_s26 }
  0x64   : > { %p4283_p2 = scmp.ne.s32.totalorder %s193_s26, %s4282_s18  ;;  %p4291_p6 = scmp.lt.s32.totalorder %s4282_s18, %s4282_s18 }
  0x66   : > { %p4285_p8 = pnand %p4283_p2, %p4618_p9  ;;  %p4292_p0 = por %p4291_p6, %p4290_p3 }
  0x68   : > { %p4286_p4 = pneg %p4285_p8 }
  0x6a   : > { %p4293_p7 = pnand %p4292_p0, %p4286_p4 }
  0x6c   : > { %4296 = shalt.err (!%p4293_p7)
}
  0x6d   : > { %s5236_s4 = smov 64   ;;  %s31_s5 = sadd.s32 1, %s4449_s23 }
  0x6e   : > { %3864 = dma.hbm_to_vmem [thread:$0]  (!%p4598_p5), %s5202_s3, 1024, %s193_s26, [#allocation10], %s5236_s4, %s5236_s4, %s4462_s8  }
  0x6f   : > { %s34_s7 = sadd.s32 1, %s4453_s24  ;;  %p32_p0 = scmp.ge.s32.totalorder %s31_s5, 2 }
  0x70   : > { %s206_s27 = sand.u32 1, %s4437_s20   ;;  %s3195_s14 = sshll.u32 %s4449_s23, 2 }
  0x71   : > { %s3193_s12 = sshll.u32 %s206_s27, 10  ;;  %s5261_s5 = smov (%p32_p0, %s31_s5), 0 }
  0x72   : > { %s5263_s7 = smov (!%p32_p0, %s34_s7), %s4453_s24  ;;  %s39_s10 = ssub.s32 %s4449_s23, %s5261_s5 }
  0x73   : > { %p36_p7 = scmp.ge.s32.totalorder %s5263_s7, 2  ;;  %s3446_s28 = sshll.u32 %s4453_s24, 9 }
  0x74   : > { %s210_s11 = scalar_lea.vmem [#allocation3], %s3193_s12  ;;  %s217_s26 = sadd.s32 %s3446_s28, %s3195_s14 }
  0x75   : > { %s220_s8 = sshll.u32 %s210_s11, 4  ;;  %s5265_s7 = smov (%p36_p7, %s5263_s7), 0  ;;  %s4699_s8 = int_to_ptr.vmem [resolvable:$true] %s220_s8 }
  0x76   : > { %s38_s15 = ssub.s32 %s4453_s24, %s5265_s7  ;;  %s3197_s18 = sshll.u32 %s217_s26, 6 }
  0x77   : > { %s40_s4 = sor.u32 %s39_s10, %s38_s15  ;;  %p130_p5 = scmp.eq.s32.totalorder %s38_s15, 0 }
  0x78   : > { %p41_p9 = scmp.eq.s32.totalorder %s40_s4, 0  ;;  %s4706_s1 = scalar_lea.hbm %s5199_s0, %s3197_s18 }
  0x79   : > { %s5237_s12 = sadd.s32 1, %s4425_s17  ;;  %s5238_s14 = sadd.s32 1, %s4437_s20 }
  0x7a   : > { %s4711_s11 = scalar_select %p130_p5, %s4425_s17, %s5237_s12  }
  0x7b   : > { %s4716_s28 = scalar_select %p41_p9, %s4437_s20, %s5238_s14  }
  0x7c   : > { %s4718_s2 = scalar_lea.sflag [#allocation4], %s206_s27  ;;  %s4297_s10 = scalar_lea.hbm %s4706_s1, 16384 }
  0x7d   : > { %p4298_p10 = scmp.ne.s32.totalorder %s4706_s1, %s4297_s10  ;;  %p5239_p12 = scmp.ne.s32.totalorder %s5232_s13, 0 }
  0x7e   : > { %s4302_s18 = scalar_lea.hbm %s5199_s0, 65536  ;;  %p4303_p2 = scmp.lt.u32.totalorder %s4706_s1, %s5199_s0 }
  0x7f   : > { %p4299_p11 = pneg %p5239_p12  ;;  %p4304_p8 = scmp.lt.u32.totalorder %s4302_s18, %s4297_s10 }
  0x80   : > { %p4306_p3 = scmp.lt.u32.totalorder %s4297_s10, %s4706_s1 }
  0x81   : > { %p4300_p13 = pnand %p4299_p11, %p4298_p10  ;;  %p4305_p4 = por %p4304_p8, %p4303_p2 }
  0x83   : > { %p4301_p1 = pneg %p4300_p13  ;;  %p4307_p6 = por %p4306_p3, %p4305_p4 }
  0x85   : > { %p4308_p0 = pnand %p4307_p6, %p4301_p1 }
  0x87   : > { %4311 = shalt.err (!%p4308_p0)
}
  0x88   : > { %s4312_s27 = scalar_lea.vmem %s4699_s8, 16384  ;;  %s4464_s25 = smov [#allocation3]  }
  0x89   : > { %p4313_p7 = scmp.ne.s32.totalorder %s4699_s8, %s4312_s27  ;;  %s4317_s12 = sshll.u32 %s4464_s25, 4  ;;  %s4318_s12 = int_to_ptr.vmem [resolvable:$false] %s4317_s12 }
  0x8a   : > { %s4319_s14 = scalar_lea.vmem %s4318_s12, 32768  ;;  %p4320_p10 = scmp.lt.s32.totalorder %s4699_s8, %s4318_s12 }
  0x8b   : > { %p4315_p5 = pnand %p4313_p7, %p4299_p11  ;;  %p4321_p13 = scmp.lt.s32.totalorder %s4319_s14, %s4312_s27 }
  0x8d   : > { %p4316_p9 = pneg %p4315_p5  ;;  %p4322_p2 = por %p4321_p13, %p4320_p10 }
  0x8f   : > { %p4323_p8 = pnand %p4322_p2, %p4316_p9 }
  0x91   : > { %4326 = shalt.err (!%p4323_p8)
}
  0x92   : > { %s4465_s10 = smov 512   ;;  %s4466_s26 = smov 256  }
  0x93   : > { %s4467_s15 = smov 16   ;;  %p5240_p11 = scmp.ne.s32.totalorder %s5230_s9, 0 }
  0x94   : > { %3868 = dma.hbm_to_vmem [thread:$0]  (!%p5239_p12), %s4706_s1, 16384, %s4699_s8, %s4718_s2, %s4465_s10, %s4466_s26, %s4467_s15  }
  0x95   : > { %232 = sbr.rel (%p5240_p11) target bundleno = 1032 (0x408), region = 36  ;;  %s234_s18 = sand.u32 (!%p5240_p11), 1, %s4433_s19  }
  0x96   : > { %s3199_s4 = sshll.u32 (!%p5240_p11), %s234_s18, 10  ;;  %s235_s30 = scalar_lea.sflag (!%p5240_p11), [#allocation4], %s234_s18 }
  0x97   : > { %s4749_s27 = scalar_lea.vmem (!%p5240_p11), [#allocation3], %s3199_s4  ;;  %p5241_p1 = scmp.ne.s32.totalorder (!%p5240_p11), %s5225_s6, 0 }
  0x9c   : > { %4400 = dma.done.wait (%p5241_p1), %s235_s30, 16384  }
  0x9d   : > { %4402 = vsyncadd (%p5241_p1), %s235_s30, 4294950912  ;;  %p5242_p4 = scmp.ne.s32.totalorder %s5223_s29, 0 }
  0x9f   : > { %4404 = dma.done.wait (%p5242_p4), [#allocation7], 8208  }
  0xa0   : > { %4406 = vsyncadd (%p5242_p4), [#allocation7], 4294959088 }
  0xa1   : > { %4408 = dma.done.wait (%p5242_p4), [#allocation10], 1024  }
  0xa2   : > { %4410 = vsyncadd (%p5242_p4), [#allocation10], 4294966272  ;;  %s272_s1 = sand.u32 1, %s4421_s16   ;;  %p3204_p12 = scmp.ne.s32.totalorder %s4441_s21, 0 }
  0xa3   : > { %s3203_s2 = sshll.u32 %s272_s1, 8  ;;  %v4468_v0 = vmov (!%p3204_p12), 0.0  }
  0xa4   : > { %s4766_s9 = scalar_lea.vmem [#allocation11], %s3203_s2  ;;  %282 = sbr.rel (%p3204_p12) target bundleno = 196 (0xc4), region = 56  ;;  %283 = vst [vmem:[#allocation2] sm:$0xff] (!%p3204_p12), %v4468_v0  ;;  %284 = vst [vmem:[#allocation2 + $0x8] sm:$0xff] (!%p3204_p12), %v4468_v0 }
  0xa5   : > { %285 = vst [vmem:[#allocation2 + $0x10] sm:$0xff] (!%p3204_p12), %v4468_v0  ;;  %286 = vst [vmem:[#allocation2 + $0x18] sm:$0xff] (!%p3204_p12), %v4468_v0 }
  0xa6   : > { %287 = vst [vmem:[#allocation2 + $0x20] sm:$0xff] (!%p3204_p12), %v4468_v0  ;;  %288 = vst [vmem:[#allocation2 + $0x28] sm:$0xff] (!%p3204_p12), %v4468_v0 }
  0xa7   : > { %289 = vst [vmem:[#allocation2 + $0x30] sm:$0xff] (!%p3204_p12), %v4468_v0  ;;  %290 = vst [vmem:[#allocation2 + $0x38] sm:$0xff] (!%p3204_p12), %v4468_v0 }
  0xa8   : > { %291 = vst [vmem:[#allocation2 + $0x40] sm:$0xff] (!%p3204_p12), %v4468_v0  ;;  %292 = vst [vmem:[#allocation2 + $0x48] sm:$0xff] (!%p3204_p12), %v4468_v0 }
  0xa9   : > { %293 = vst [vmem:[#allocation2 + $0x50] sm:$0xff] (!%p3204_p12), %v4468_v0  ;;  %294 = vst [vmem:[#allocation2 + $0x58] sm:$0xff] (!%p3204_p12), %v4468_v0 }
  0xaa   : > { %295 = vst [vmem:[#allocation2 + $0x60] sm:$0xff] (!%p3204_p12), %v4468_v0  ;;  %296 = vst [vmem:[#allocation2 + $0x68] sm:$0xff] (!%p3204_p12), %v4468_v0 }
  0xab   : > { %297 = vst [vmem:[#allocation2 + $0x70] sm:$0xff] %v4468_v0  ;;  %298 = vst [vmem:[#allocation2 + $0x78] sm:$0xff] %v4468_v0 }
  0xac   : > { %299 = vst [vmem:[#allocation2 + $0x80] sm:$0xff] %v4468_v0  ;;  %300 = vst [vmem:[#allocation2 + $0x88] sm:$0xff] %v4468_v0 }
  0xad   : > { %301 = vst [vmem:[#allocation2 + $0x90] sm:$0xff] %v4468_v0  ;;  %302 = vst [vmem:[#allocation2 + $0x98] sm:$0xff] %v4468_v0 }
  0xae   : > { %303 = vst [vmem:[#allocation2 + $0xa0] sm:$0xff] %v4468_v0  ;;  %304 = vst [vmem:[#allocation2 + $0xa8] sm:$0xff] %v4468_v0 }
  0xaf   : > { %305 = vst [vmem:[#allocation2 + $0xb0] sm:$0xff] %v4468_v0  ;;  %306 = vst [vmem:[#allocation2 + $0xb8] sm:$0xff] %v4468_v0 }
  0xb0   : > { %307 = vst [vmem:[#allocation2 + $0xc0] sm:$0xff] %v4468_v0  ;;  %308 = vst [vmem:[#allocation2 + $0xc8] sm:$0xff] %v4468_v0 }
  0xb1   : > { %309 = vst [vmem:[#allocation2 + $0xd0] sm:$0xff] %v4468_v0  ;;  %310 = vst [vmem:[#allocation2 + $0xd8] sm:$0xff] %v4468_v0 }
  0xb2   : > { %311 = vst [vmem:[#allocation2 + $0xe0] sm:$0xff] %v4468_v0  ;;  %312 = vst [vmem:[#allocation2 + $0xe8] sm:$0xff] %v4468_v0 }
  0xb3   : > { %313 = vst [vmem:[#allocation2 + $0xf0] sm:$0xff] %v4468_v0  ;;  %314 = vst [vmem:[#allocation2 + $0xf8] sm:$0xff] %v4468_v0 }
  0xb4   : > { %315 = vst [vmem:[#allocation2 + $0x100] sm:$0xff] %v4468_v0  ;;  %316 = vst [vmem:[#allocation2 + $0x108] sm:$0xff] %v4468_v0 }
  0xb5   : > { %317 = vst [vmem:[#allocation2 + $0x110] sm:$0xff] %v4468_v0  ;;  %318 = vst [vmem:[#allocation2 + $0x118] sm:$0xff] %v4468_v0 }
  0xb6   : > { %319 = vst [vmem:[#allocation2 + $0x120] sm:$0xff] %v4468_v0  ;;  %320 = vst [vmem:[#allocation2 + $0x128] sm:$0xff] %v4468_v0 }
  0xb7   : > { %321 = vst [vmem:[#allocation2 + $0x130] sm:$0xff] %v4468_v0  ;;  %322 = vst [vmem:[#allocation2 + $0x138] sm:$0xff] %v4468_v0 }
  0xb8   : > { %323 = vst [vmem:[#allocation2 + $0x140] sm:$0xff] %v4468_v0  ;;  %324 = vst [vmem:[#allocation2 + $0x148] sm:$0xff] %v4468_v0 }
  0xb9   : > { %325 = vst [vmem:[#allocation2 + $0x150] sm:$0xff] %v4468_v0  ;;  %326 = vst [vmem:[#allocation2 + $0x158] sm:$0xff] %v4468_v0 }
  0xba   : > { %327 = vst [vmem:[#allocation2 + $0x160] sm:$0xff] %v4468_v0  ;;  %328 = vst [vmem:[#allocation2 + $0x168] sm:$0xff] %v4468_v0 }
  0xbb   : > { %329 = vst [vmem:[#allocation2 + $0x170] sm:$0xff] %v4468_v0  ;;  %330 = vst [vmem:[#allocation2 + $0x178] sm:$0xff] %v4468_v0 }
  0xbc   : > { %331 = vst [vmem:[#allocation2 + $0x180] sm:$0xff] %v4468_v0  ;;  %332 = vst [vmem:[#allocation2 + $0x188] sm:$0xff] %v4468_v0 }
  0xbd   : > { %333 = vst [vmem:[#allocation2 + $0x190] sm:$0xff] %v4468_v0  ;;  %334 = vst [vmem:[#allocation2 + $0x198] sm:$0xff] %v4468_v0 }
  0xbe   : > { %335 = vst [vmem:[#allocation2 + $0x1a0] sm:$0xff] %v4468_v0  ;;  %336 = vst [vmem:[#allocation2 + $0x1a8] sm:$0xff] %v4468_v0 }
  0xbf   : > { %337 = vst [vmem:[#allocation2 + $0x1b0] sm:$0xff] %v4468_v0  ;;  %338 = vst [vmem:[#allocation2 + $0x1b8] sm:$0xff] %v4468_v0 }
  0xc0   : > { %339 = vst [vmem:[#allocation2 + $0x1c0] sm:$0xff] %v4468_v0  ;;  %340 = vst [vmem:[#allocation2 + $0x1c8] sm:$0xff] %v4468_v0 }
  0xc1   : > { %341 = vst [vmem:[#allocation2 + $0x1d0] sm:$0xff] %v4468_v0  ;;  %342 = vst [vmem:[#allocation2 + $0x1d8] sm:$0xff] %v4468_v0 }
  0xc2   : > { %343 = vst [vmem:[#allocation2 + $0x1e0] sm:$0xff] %v4468_v0  ;;  %344 = vst [vmem:[#allocation2 + $0x1e8] sm:$0xff] %v4468_v0 }
  0xc3   : > { %345 = vst [vmem:[#allocation2 + $0x1f0] sm:$0xff] %v4468_v0  ;;  %346 = vst [vmem:[#allocation2 + $0x1f8] sm:$0xff] %v4468_v0 }
  0xc4 PF: > { %s3205_s29 = sshll.u32 %s4441_s21, 9  ;;  %v4469_v1 = vmov 0   ;;  %v4015_v2 = vld [vmem:[%s4749_s27 + $0x4] ss:$16 sps:$4 sm:$0xff]   ;;  %v4018_v3 = vld [vmem:[%s4749_s27 + $0xc] ss:$16 sps:$4 sm:$0xff]  }
  0xc5   : > { %1440 = vmatprep.subr.bf16.mxu0 %v4469_v1  ;;  %1729 = vmatprep.subr.bf16.mxu1 %v4469_v1  ;;  %s348_s6 = sshra.s32 %s3205_s29, 3  ;;  %v4013_v36 = vld [vmem:[%s4749_s27] ss:$16 sps:$4 sm:$0xff]   ;;  %v4016_v37 = vld [vmem:[%s4749_s27 + $0x8] ss:$16 sps:$4 sm:$0xff]   ;;  %p3367_p3 = scmp.ne.s32.totalorder %s4441_s21, 1 }
  0xc6   : > { %s3206_s13 = sshll.u32 %s348_s6, 2  ;;  %1472 = vmatprep.mubr.bf16.mxu0 %v4015_v2  ;;  %1761 = vmatprep.mubr.bf16.mxu1 %v4018_v3  ;;  %v4019_v38 = vld [vmem:[%s4749_s27 + $0x24] ss:$16 sps:$4 sm:$0xff]   ;;  %v4021_v39 = vld [vmem:[%s4749_s27 + $0x2c] ss:$16 sps:$4 sm:$0xff]  }
  0xc7   : > { %s4838_s8 = scalar_lea.vmem [#allocation6], %s3206_s13  ;;  %v4023_v40 = vld [vmem:[%s4749_s27 + $0x20] ss:$16 sps:$4 sm:$0xff]   ;;  %v4024_v41 = vld [vmem:[%s4749_s27 + $0x28] ss:$16 sps:$4 sm:$0xff]  }
  0xc8   : > { %v3981_v4 = vld [vmem:[%s4838_s8] sm:$0xff]   ;;  %v3983_v6 = vld [vmem:[%s4838_s8 + $0x8] sm:$0xff]   ;;  %v3985_v8 = vld [vmem:[%s4838_s8 + $0x10] sm:$0xff]  }
  0xc9   : > { %v3982_v5 = vld [vmem:[%s4838_s8 + $0x80] sm:$0xff]   ;;  %1441 = vmatpush1.bf16.msra.mxu0 %v3981_v4  ;;  %v3984_v7 = vld [vmem:[%s4838_s8 + $0x88] sm:$0xff]   ;;  %v3986_v9 = vld [vmem:[%s4838_s8 + $0x90] sm:$0xff]  }
  0xca   : > { %1730 = vmatpush1.bf16.msra.mxu1 %v3982_v5  ;;  %1442 = vmatprep.subr.bf16.mxu0 %v4469_v1  ;;  %v3987_v10 = vld [vmem:[%s4838_s8 + $0x18] sm:$0xff]   ;;  %v3989_v12 = vld [vmem:[%s4838_s8 + $0x20] sm:$0xff]   ;;  %v3991_v14 = vld [vmem:[%s4838_s8 + $0x28] sm:$0xff]  }
  0xcb   : > { %1731 = vmatprep.subr.bf16.mxu1 %v4469_v1  ;;  %v3988_v11 = vld [vmem:[%s4838_s8 + $0x98] sm:$0xff]   ;;  %v3990_v13 = vld [vmem:[%s4838_s8 + $0xa0] sm:$0xff]   ;;  %v3992_v15 = vld [vmem:[%s4838_s8 + $0xa8] sm:$0xff]  }
  0xcc   : > { %v3993_v16 = vld [vmem:[%s4838_s8 + $0x30] sm:$0xff]   ;;  %v3995_v18 = vld [vmem:[%s4838_s8 + $0x38] sm:$0xff]   ;;  %v3997_v20 = vld [vmem:[%s4838_s8 + $0x40] sm:$0xff]  }
  0xcd   : > { %1443 = vmatpush1.bf16.msra.mxu0 %v3983_v6  ;;  %v3994_v17 = vld [vmem:[%s4838_s8 + $0xb0] sm:$0xff]   ;;  %v3996_v19 = vld [vmem:[%s4838_s8 + $0xb8] sm:$0xff]   ;;  %v3998_v21 = vld [vmem:[%s4838_s8 + $0xc0] sm:$0xff]  }
  0xce   : > { %1732 = vmatpush1.bf16.msra.mxu1 %v3984_v7  ;;  %1444 = vmatprep.subr.bf16.mxu0 %v4469_v1  ;;  %v3999_v22 = vld [vmem:[%s4838_s8 + $0x48] sm:$0xff]   ;;  %v4001_v24 = vld [vmem:[%s4838_s8 + $0x50] sm:$0xff]   ;;  %v4003_v26 = vld [vmem:[%s4838_s8 + $0x58] sm:$0xff]  }
  0xcf   : > { %1733 = vmatprep.subr.bf16.mxu1 %v4469_v1  ;;  %v4000_v23 = vld [vmem:[%s4838_s8 + $0xc8] sm:$0xff]   ;;  %v4002_v25 = vld [vmem:[%s4838_s8 + $0xd0] sm:$0xff]   ;;  %v4004_v27 = vld [vmem:[%s4838_s8 + $0xd8] sm:$0xff]  }
  0xd0   : > { %v4005_v28 = vld [vmem:[%s4838_s8 + $0x60] sm:$0xff]   ;;  %v4007_v30 = vld [vmem:[%s4838_s8 + $0x68] sm:$0xff]   ;;  %v4009_v32 = vld [vmem:[%s4838_s8 + $0x70] sm:$0xff]  }
  0xd1   : > { %1445 = vmatpush1.bf16.msra.mxu0 %v3985_v8  ;;  %v4006_v29 = vld [vmem:[%s4838_s8 + $0xe0] sm:$0xff]   ;;  %v4008_v31 = vld [vmem:[%s4838_s8 + $0xe8] sm:$0xff]   ;;  %v4010_v33 = vld [vmem:[%s4838_s8 + $0xf0] sm:$0xff]  }
  0xd2   : > { %1734 = vmatpush1.bf16.msra.mxu1 %v3986_v9  ;;  %1446 = vmatprep.subr.bf16.mxu0 %v4469_v1  ;;  %v4011_v34 = vld [vmem:[%s4838_s8 + $0x78] sm:$0xff]   ;;  %v4025_v42 = vld [vmem:[%s4749_s27 + $0x44] ss:$16 sps:$4 sm:$0xff]   ;;  %v4029_v44 = vld [vmem:[%s4749_s27 + $0x40] ss:$16 sps:$4 sm:$0xff]  }
  0xd3   : > { %1735 = vmatprep.subr.bf16.mxu1 %v4469_v1  ;;  %v4012_v35 = vld [vmem:[%s4838_s8 + $0xf8] sm:$0xff]   ;;  %v4031_v46 = vld [vmem:[%s4749_s27 + $0x64] ss:$16 sps:$4 sm:$0xff]   ;;  %v4035_v48 = vld [vmem:[%s4749_s27 + $0x60] ss:$16 sps:$4 sm:$0xff]  }
  0xd4   : > { %v4027_v43 = vld [vmem:[%s4749_s27 + $0x4c] ss:$16 sps:$4 sm:$0xff]   ;;  %v4030_v45 = vld [vmem:[%s4749_s27 + $0x48] ss:$16 sps:$4 sm:$0xff]   ;;  %v4037_v50 = vld [vmem:[%s4749_s27 + $0x84] ss:$16 sps:$4 sm:$0xff]  }
  0xd5   : > { %1447 = vmatpush1.bf16.msra.mxu0 %v3987_v10  ;;  %v4033_v47 = vld [vmem:[%s4749_s27 + $0x6c] ss:$16 sps:$4 sm:$0xff]   ;;  %v4036_v49 = vld [vmem:[%s4749_s27 + $0x68] ss:$16 sps:$4 sm:$0xff]   ;;  %v4041_v52 = vld [vmem:[%s4749_s27 + $0x80] ss:$16 sps:$4 sm:$0xff]  }
  0xd6   : > { %1736 = vmatpush1.bf16.msra.mxu1 %v3988_v11  ;;  %1448 = vmatprep.subr.bf16.mxu0 %v4469_v1  ;;  %v4039_v51 = vld [vmem:[%s4749_s27 + $0x8c] ss:$16 sps:$4 sm:$0xff]   ;;  %v4042_v53 = vld [vmem:[%s4749_s27 + $0x88] ss:$16 sps:$4 sm:$0xff]   ;;  %v4043_v54 = vld [vmem:[%s4749_s27 + $0xa4] ss:$16 sps:$4 sm:$0xff]  }
  0xd7   : > { %1737 = vmatprep.subr.bf16.mxu1 %v4469_v1  ;;  %v4045_v55 = vld [vmem:[%s4749_s27 + $0xac] ss:$16 sps:$4 sm:$0xff]   ;;  %v4047_v56 = vld [vmem:[%s4749_s27 + $0xa0] ss:$16 sps:$4 sm:$0xff]   ;;  %v4048_v57 = vld [vmem:[%s4749_s27 + $0xa8] ss:$16 sps:$4 sm:$0xff]  }
  0xd8   : > { %v4049_v58 = vld [vmem:[%s4749_s27 + $0xc4] ss:$16 sps:$4 sm:$0xff]   ;;  %v4051_v59 = vld [vmem:[%s4749_s27 + $0xcc] ss:$16 sps:$4 sm:$0xff]   ;;  %v4053_v60 = vld [vmem:[%s4749_s27 + $0xc0] ss:$16 sps:$4 sm:$0xff]  }
  0xd9   : > { %1449 = vmatpush1.bf16.msra.mxu0 %v3989_v12  ;;  %v4054_v61 = vld [vmem:[%s4749_s27 + $0xc8] ss:$16 sps:$4 sm:$0xff]   ;;  %v4055_v62 = vld [vmem:[%s4749_s27 + $0xe4] ss:$16 sps:$4 sm:$0xff]   ;;  %v4057_v63 = vld [vmem:[%s4749_s27 + $0xec] ss:$16 sps:$4 sm:$0xff]  }
  0xda   : > { %1738 = vmatpush1.bf16.msra.mxu1 %v3990_v13  ;;  %1450 = vmatprep.subr.bf16.mxu0 %v4469_v1  ;;  %v4059_v0 = vld [vmem:[%s4749_s27 + $0xe0] ss:$16 sps:$4 sm:$0xff]   ;;  %v4061_v2 = vld [vmem:[%s4749_s27 + $0x104] ss:$16 sps:$4 sm:$0xff]   ;;  %v4063_v3 = vld [vmem:[%s4749_s27 + $0x10c] ss:$16 sps:$4 sm:$0xff]  }
  0xdb   : > { %1739 = vmatprep.subr.bf16.mxu1 %v4469_v1  ;;  %v4065_v4 = vld [vmem:[%s4749_s27 + $0x100] ss:$16 sps:$4 sm:$0xff]   ;;  %v4066_v5 = vld [vmem:[%s4749_s27 + $0x108] ss:$16 sps:$4 sm:$0xff]   ;;  %v4067_v6 = vld [vmem:[%s4749_s27 + $0x124] ss:$16 sps:$4 sm:$0xff]  }
  0xdc   : > { %v4069_v7 = vld [vmem:[%s4749_s27 + $0x12c] ss:$16 sps:$4 sm:$0xff]   ;;  %v4071_v8 = vld [vmem:[%s4749_s27 + $0x120] ss:$16 sps:$4 sm:$0xff]   ;;  %v4072_v9 = vld [vmem:[%s4749_s27 + $0x128] ss:$16 sps:$4 sm:$0xff]  }
  0xdd   : > { %1451 = vmatpush1.bf16.msra.mxu0 %v3991_v14  ;;  %v4073_v10 = vld [vmem:[%s4749_s27 + $0x144] ss:$16 sps:$4 sm:$0xff]   ;;  %v4075_v11 = vld [vmem:[%s4749_s27 + $0x14c] ss:$16 sps:$4 sm:$0xff]   ;;  %v4077_v12 = vld [vmem:[%s4749_s27 + $0x140] ss:$16 sps:$4 sm:$0xff]  }
  0xde   : > { %1740 = vmatpush1.bf16.msra.mxu1 %v3992_v15  ;;  %1452 = vmatprep.subr.bf16.mxu0 %v4469_v1  ;;  %v4078_v13 = vld [vmem:[%s4749_s27 + $0x148] ss:$16 sps:$4 sm:$0xff]   ;;  %v4079_v14 = vld [vmem:[%s4749_s27 + $0x164] ss:$16 sps:$4 sm:$0xff]   ;;  %v4081_v15 = vld [vmem:[%s4749_s27 + $0x16c] ss:$16 sps:$4 sm:$0xff]  }
  0xdf   : > { %1741 = vmatprep.subr.bf16.mxu1 %v4469_v1 }
  0xe1   : > { %1453 = vmatpush1.bf16.msra.mxu0 %v3993_v16  ;;  %v4083_v16 = vld [vmem:[%s4749_s27 + $0x160] ss:$16 sps:$4 sm:$0xff]  }
  0xe2   : > { %1742 = vmatpush1.bf16.msra.mxu1 %v3994_v17  ;;  %1454 = vmatprep.subr.bf16.mxu0 %v4469_v1  ;;  %v4084_v17 = vld [vmem:[%s4749_s27 + $0x168] ss:$16 sps:$4 sm:$0xff]  }
  0xe3   : > { %1743 = vmatprep.subr.bf16.mxu1 %v4469_v1 }
  0xe5   : > { %1455 = vmatpush1.bf16.msra.mxu0 %v3995_v18  ;;  %v4085_v18 = vld [vmem:[%s4749_s27 + $0x184] ss:$16 sps:$4 sm:$0xff]  }
  0xe6   : > { %1744 = vmatpush1.bf16.msra.mxu1 %v3996_v19  ;;  %1456 = vmatprep.subr.bf16.mxu0 %v4469_v1  ;;  %v4087_v19 = vld [vmem:[%s4749_s27 + $0x18c] ss:$16 sps:$4 sm:$0xff]  }
  0xe7   : > { %1745 = vmatprep.subr.bf16.mxu1 %v4469_v1 }
  0xe9   : > { %1457 = vmatpush1.bf16.msra.mxu0 %v3997_v20  ;;  %v4089_v20 = vld [vmem:[%s4749_s27 + $0x180] ss:$16 sps:$4 sm:$0xff]  }
  0xea   : > { %1746 = vmatpush1.bf16.msra.mxu1 %v3998_v21  ;;  %1458 = vmatprep.subr.bf16.mxu0 %v4469_v1  ;;  %v4090_v21 = vld [vmem:[%s4749_s27 + $0x188] ss:$16 sps:$4 sm:$0xff]  }
  0xeb   : > { %1747 = vmatprep.subr.bf16.mxu1 %v4469_v1 }
  0xed   : > { %1459 = vmatpush1.bf16.msra.mxu0 %v3999_v22  ;;  %v4091_v22 = vld [vmem:[%s4749_s27 + $0x1a4] ss:$16 sps:$4 sm:$0xff]  }
  0xee   : > { %1748 = vmatpush1.bf16.msra.mxu1 %v4000_v23  ;;  %1460 = vmatprep.subr.bf16.mxu0 %v4469_v1  ;;  %v4093_v23 = vld [vmem:[%s4749_s27 + $0x1ac] ss:$16 sps:$4 sm:$0xff]  }
  0xef   : > { %1749 = vmatprep.subr.bf16.mxu1 %v4469_v1 }
  0xf1   : > { %1461 = vmatpush1.bf16.msra.mxu0 %v4001_v24  ;;  %v4095_v24 = vld [vmem:[%s4749_s27 + $0x1a0] ss:$16 sps:$4 sm:$0xff]  }
  0xf2   : > { %1750 = vmatpush1.bf16.msra.mxu1 %v4002_v25  ;;  %1462 = vmatprep.subr.bf16.mxu0 %v4469_v1  ;;  %v4096_v25 = vld [vmem:[%s4749_s27 + $0x1a8] ss:$16 sps:$4 sm:$0xff]  }
  0xf3   : > { %1751 = vmatprep.subr.bf16.mxu1 %v4469_v1 }
  0xf5   : > { %1463 = vmatpush1.bf16.msra.mxu0 %v4003_v26  ;;  %v4097_v26 = vld [vmem:[%s4749_s27 + $0x1c4] ss:$16 sps:$4 sm:$0xff]  }
  0xf6   : > { %1752 = vmatpush1.bf16.msra.mxu1 %v4004_v27  ;;  %1464 = vmatprep.subr.bf16.mxu0 %v4469_v1  ;;  %v4099_v27 = vld [vmem:[%s4749_s27 + $0x1cc] ss:$16 sps:$4 sm:$0xff]  }
  0xf7   : > { %1753 = vmatprep.subr.bf16.mxu1 %v4469_v1 }
  0xf9   : > { %1465 = vmatpush1.bf16.msra.mxu0 %v4005_v28  ;;  %v4101_v28 = vld [vmem:[%s4749_s27 + $0x1c0] ss:$16 sps:$4 sm:$0xff]  }
  0xfa   : > { %1754 = vmatpush1.bf16.msra.mxu1 %v4006_v29  ;;  %1466 = vmatprep.subr.bf16.mxu0 %v4469_v1  ;;  %v4102_v29 = vld [vmem:[%s4749_s27 + $0x1c8] ss:$16 sps:$4 sm:$0xff]  }
  0xfb   : > { %1755 = vmatprep.subr.bf16.mxu1 %v4469_v1 }
  0xfd   : > { %1467 = vmatpush1.bf16.msra.mxu0 %v4007_v30  ;;  %v4103_v30 = vld [vmem:[%s4749_s27 + $0x1e4] ss:$16 sps:$4 sm:$0xff]  }
  0xfe   : > { %1756 = vmatpush1.bf16.msra.mxu1 %v4008_v31  ;;  %1468 = vmatprep.subr.bf16.mxu0 %v4469_v1  ;;  %v4105_v31 = vld [vmem:[%s4749_s27 + $0x1ec] ss:$16 sps:$4 sm:$0xff]  }
  0xff   : > { %1757 = vmatprep.subr.bf16.mxu1 %v4469_v1 }
 0x101   : > { %1469 = vmatpush1.bf16.msra.mxu0 %v4009_v32  ;;  %v4107_v32 = vld [vmem:[%s4749_s27 + $0x1e0] ss:$16 sps:$4 sm:$0xff]  }
 0x102   : > { %1758 = vmatpush1.bf16.msra.mxu1 %v4010_v33  ;;  %1470 = vmatprep.subr.bf16.mxu0 %v4469_v1  ;;  %v4108_v33 = vld [vmem:[%s4749_s27 + $0x1e8] ss:$16 sps:$4 sm:$0xff]  }
 0x103   : > { %1759 = vmatprep.subr.bf16.mxu1 %v4469_v1  ;;  %v4060_v1 = vld [vmem:[%s4749_s27 + $0xe8] ss:$16 sps:$4 sm:$0xff]  }
 0x105   : > { %1471 = vmatpush1.bf16.msra.mxu0 %v4011_v34  ;;  %v4109_v34 = vld [vmem:[%s4749_s27 + $0x204] ss:$16 sps:$4 sm:$0xff]  }
 0x106   : > { %1760 = vmatpush1.bf16.msra.mxu1 %v4012_v35  ;;  %v4111_v35 = vld [vmem:[%s4749_s27 + $0x20c] ss:$16 sps:$4 sm:$0xff]  }
 0x108   : > { %1473 = vmatmul.mubr.bf16.vlgmr.msra.gmra.mrb[0].mxu0 %v4013_v36  ;;  %v4113_v36 = vld [vmem:[%s4749_s27 + $0x200] ss:$16 sps:$4 sm:$0xff]  }
 0x109   : > { %1762 = vmatmul.mubr.bf16.vlgmr.msra.gmra.mrb[0].mxu1 %v4016_v37  ;;  %1480 = vmatprep.mubr.bf16.mxu0 %v4019_v38  ;;  %v4114_v37 = vld [vmem:[%s4749_s27 + $0x208] ss:$16 sps:$4 sm:$0xff]   ;;  %v4115_v38 = vld [vmem:[%s4749_s27 + $0x224] ss:$16 sps:$4 sm:$0xff]  }
 0x10a   : > { %1769 = vmatprep.mubr.bf16.mxu1 %v4021_v39  ;;  %v4117_v39 = vld [vmem:[%s4749_s27 + $0x22c] ss:$16 sps:$4 sm:$0xff]  }
 0x110   : > { %1481 = vmatmul.mubr.bf16.gmra.mrb[4].mxu0 %v4023_v40  ;;  %v4119_v40 = vld [vmem:[%s4749_s27 + $0x220] ss:$16 sps:$4 sm:$0xff]  }
 0x111   : > { %1770 = vmatmul.mubr.bf16.gmra.mrb[4].mxu1 %v4024_v41  ;;  %1488 = vmatprep.mubr.bf16.mxu0 %v4025_v42  ;;  %v4120_v41 = vld [vmem:[%s4749_s27 + $0x228] ss:$16 sps:$4 sm:$0xff]   ;;  %v4121_v42 = vld [vmem:[%s4749_s27 + $0x244] ss:$16 sps:$4 sm:$0xff]  }
 0x112   : > { %1777 = vmatprep.mubr.bf16.mxu1 %v4027_v43  ;;  %v4123_v43 = vld [vmem:[%s4749_s27 + $0x24c] ss:$16 sps:$4 sm:$0xff]  }
 0x118   : > { %1489 = vmatmul.mubr.bf16.gmra.mrb[8].mxu0 %v4029_v44  ;;  %v4125_v44 = vld [vmem:[%s4749_s27 + $0x240] ss:$16 sps:$4 sm:$0xff]  }
 0x119   : > { %1778 = vmatmul.mubr.bf16.gmra.mrb[8].mxu1 %v4030_v45  ;;  %1496 = vmatprep.mubr.bf16.mxu0 %v4031_v46  ;;  %v4126_v45 = vld [vmem:[%s4749_s27 + $0x248] ss:$16 sps:$4 sm:$0xff]   ;;  %v4127_v46 = vld [vmem:[%s4749_s27 + $0x264] ss:$16 sps:$4 sm:$0xff]  }
 0x11a   : > { %1785 = vmatprep.mubr.bf16.mxu1 %v4033_v47  ;;  %v4129_v47 = vld [vmem:[%s4749_s27 + $0x26c] ss:$16 sps:$4 sm:$0xff]  }
 0x120   : > { %1497 = vmatmul.mubr.bf16.gmra.mrb[12].mxu0 %v4035_v48  ;;  %v4131_v48 = vld [vmem:[%s4749_s27 + $0x260] ss:$16 sps:$4 sm:$0xff]  }
 0x121   : > { %1786 = vmatmul.mubr.bf16.gmra.mrb[12].mxu1 %v4036_v49  ;;  %1504 = vmatprep.mubr.bf16.mxu0 %v4037_v50  ;;  %v4132_v49 = vld [vmem:[%s4749_s27 + $0x268] ss:$16 sps:$4 sm:$0xff]   ;;  %v4133_v50 = vld [vmem:[%s4749_s27 + $0x284] ss:$16 sps:$4 sm:$0xff]  }
 0x122   : > { %1793 = vmatprep.mubr.bf16.mxu1 %v4039_v51  ;;  %v4135_v51 = vld [vmem:[%s4749_s27 + $0x28c] ss:$16 sps:$4 sm:$0xff]  }
 0x128   : > { %1505 = vmatmul.mubr.bf16.gmra.mrb[16].mxu0 %v4041_v52  ;;  %v4137_v52 = vld [vmem:[%s4749_s27 + $0x280] ss:$16 sps:$4 sm:$0xff]  }
 0x129   : > { %1794 = vmatmul.mubr.bf16.gmra.mrb[16].mxu1 %v4042_v53  ;;  %1512 = vmatprep.mubr.bf16.mxu0 %v4043_v54  ;;  %v4138_v53 = vld [vmem:[%s4749_s27 + $0x288] ss:$16 sps:$4 sm:$0xff]   ;;  %v4139_v54 = vld [vmem:[%s4749_s27 + $0x2a4] ss:$16 sps:$4 sm:$0xff]  }
 0x12a   : > { %1801 = vmatprep.mubr.bf16.mxu1 %v4045_v55  ;;  %v4141_v55 = vld [vmem:[%s4749_s27 + $0x2ac] ss:$16 sps:$4 sm:$0xff]  }
 0x130   : > { %1513 = vmatmul.mubr.bf16.gmra.mrb[20].mxu0 %v4047_v56  ;;  %v4143_v56 = vld [vmem:[%s4749_s27 + $0x2a0] ss:$16 sps:$4 sm:$0xff]  }
 0x131   : > { %1802 = vmatmul.mubr.bf16.gmra.mrb[20].mxu1 %v4048_v57  ;;  %1520 = vmatprep.mubr.bf16.mxu0 %v4049_v58  ;;  %v4144_v57 = vld [vmem:[%s4749_s27 + $0x2a8] ss:$16 sps:$4 sm:$0xff]   ;;  %v4145_v58 = vld [vmem:[%s4749_s27 + $0x2c4] ss:$16 sps:$4 sm:$0xff]  }
 0x132   : > { %1809 = vmatprep.mubr.bf16.mxu1 %v4051_v59  ;;  %v4147_v59 = vld [vmem:[%s4749_s27 + $0x2cc] ss:$16 sps:$4 sm:$0xff]  }
 0x138   : > { %1521 = vmatmul.mubr.bf16.gmra.mrb[24].mxu0 %v4053_v60  ;;  %v4149_v60 = vld [vmem:[%s4749_s27 + $0x2c0] ss:$16 sps:$4 sm:$0xff]  }
 0x139   : > { %1810 = vmatmul.mubr.bf16.gmra.mrb[24].mxu1 %v4054_v61  ;;  %1528 = vmatprep.mubr.bf16.mxu0 %v4055_v62  ;;  %v4150_v61 = vld [vmem:[%s4749_s27 + $0x2c8] ss:$16 sps:$4 sm:$0xff]   ;;  %v4151_v62 = vld [vmem:[%s4749_s27 + $0x2e4] ss:$16 sps:$4 sm:$0xff]  }
 0x13a   : > { %1817 = vmatprep.mubr.bf16.mxu1 %v4057_v63  ;;  %v4153_v63 = vld [vmem:[%s4749_s27 + $0x2ec] ss:$16 sps:$4 sm:$0xff]  }
 0x140   : > { %1529 = vmatmul.mubr.bf16.gmra.mrb[28].mxu0 %v4059_v0  ;;  %v4155_v0 = vld [vmem:[%s4749_s27 + $0x2e0] ss:$16 sps:$4 sm:$0xff]  }
 0x141   : > { %1818 = vmatmul.mubr.bf16.gmra.mrb[28].mxu1 %v4060_v1  ;;  %1536 = vmatprep.mubr.bf16.mxu0 %v4061_v2  ;;  %v4156_v1 = vld [vmem:[%s4749_s27 + $0x2e8] ss:$16 sps:$4 sm:$0xff]   ;;  %v4157_v2 = vld [vmem:[%s4749_s27 + $0x304] ss:$16 sps:$4 sm:$0xff]  }
 0x142   : > { %1825 = vmatprep.mubr.bf16.mxu1 %v4063_v3  ;;  %v4159_v3 = vld [vmem:[%s4749_s27 + $0x30c] ss:$16 sps:$4 sm:$0xff]  }
 0x148   : > { %1537 = vmatmul.mubr.bf16.gmra.mrb[32].mxu0 %v4065_v4  ;;  %v4161_v4 = vld [vmem:[%s4749_s27 + $0x300] ss:$16 sps:$4 sm:$0xff]  }
 0x149   : > { %1826 = vmatmul.mubr.bf16.gmra.mrb[32].mxu1 %v4066_v5  ;;  %1544 = vmatprep.mubr.bf16.mxu0 %v4067_v6  ;;  %v4162_v5 = vld [vmem:[%s4749_s27 + $0x308] ss:$16 sps:$4 sm:$0xff]   ;;  %v4163_v6 = vld [vmem:[%s4749_s27 + $0x324] ss:$16 sps:$4 sm:$0xff]  }
 0x14a   : > { %1833 = vmatprep.mubr.bf16.mxu1 %v4069_v7  ;;  %v4165_v7 = vld [vmem:[%s4749_s27 + $0x32c] ss:$16 sps:$4 sm:$0xff]  }
 0x150   : > { %1545 = vmatmul.mubr.bf16.gmra.mrb[36].mxu0 %v4071_v8  ;;  %v4167_v8 = vld [vmem:[%s4749_s27 + $0x320] ss:$16 sps:$4 sm:$0xff]  }
 0x151   : > { %1834 = vmatmul.mubr.bf16.gmra.mrb[36].mxu1 %v4072_v9  ;;  %1552 = vmatprep.mubr.bf16.mxu0 %v4073_v10  ;;  %v4168_v9 = vld [vmem:[%s4749_s27 + $0x328] ss:$16 sps:$4 sm:$0xff]   ;;  %v4169_v10 = vld [vmem:[%s4749_s27 + $0x344] ss:$16 sps:$4 sm:$0xff]  }
 0x152   : > { %1841 = vmatprep.mubr.bf16.mxu1 %v4075_v11  ;;  %v4171_v11 = vld [vmem:[%s4749_s27 + $0x34c] ss:$16 sps:$4 sm:$0xff]  }
 0x158   : > { %1553 = vmatmul.mubr.bf16.gmra.mrb[40].mxu0 %v4077_v12  ;;  %v4173_v12 = vld [vmem:[%s4749_s27 + $0x340] ss:$16 sps:$4 sm:$0xff]  }
 0x159   : > { %1842 = vmatmul.mubr.bf16.gmra.mrb[40].mxu1 %v4078_v13  ;;  %1560 = vmatprep.mubr.bf16.mxu0 %v4079_v14  ;;  %v4174_v13 = vld [vmem:[%s4749_s27 + $0x348] ss:$16 sps:$4 sm:$0xff]   ;;  %v4175_v14 = vld [vmem:[%s4749_s27 + $0x364] ss:$16 sps:$4 sm:$0xff]  }
 0x15a   : > { %1849 = vmatprep.mubr.bf16.mxu1 %v4081_v15  ;;  %v4177_v15 = vld [vmem:[%s4749_s27 + $0x36c] ss:$16 sps:$4 sm:$0xff]  }
 0x160   : > { %1561 = vmatmul.mubr.bf16.gmra.mrb[44].mxu0 %v4083_v16 }
 0x161   : > { %1850 = vmatmul.mubr.bf16.gmra.mrb[44].mxu1 %v4084_v17  ;;  %1568 = vmatprep.mubr.bf16.mxu0 %v4085_v18  ;;  %v416_v17 = vld [vmem:[#allocation2] sm:$0xff] }
 0x162   : > { %1857 = vmatprep.mubr.bf16.mxu1 %v4087_v19 }
 0x168   : > { %1569 = vmatmul.mubr.bf16.gmra.mrb[48].mxu0 %v4089_v20  ;;  %v4179_v20 = vld [vmem:[%s4749_s27 + $0x360] ss:$16 sps:$4 sm:$0xff]  }
 0x169   : > { %1858 = vmatmul.mubr.bf16.gmra.mrb[48].mxu1 %v4090_v21  ;;  %1576 = vmatprep.mubr.bf16.mxu0 %v4091_v22 }
 0x16a   : > { %1865 = vmatprep.mubr.bf16.mxu1 %v4093_v23 }
 0x170   : > { %1577 = vmatmul.mubr.bf16.gmra.mrb[52].mxu0 %v4095_v24  ;;  %v4180_v24 = vld [vmem:[%s4749_s27 + $0x368] ss:$16 sps:$4 sm:$0xff]  }
 0x171   : > { %1866 = vmatmul.mubr.bf16.gmra.mrb[52].mxu1 %v4096_v25  ;;  %1584 = vmatprep.mubr.bf16.mxu0 %v4097_v26  ;;  %v4181_v25 = vld [vmem:[%s4749_s27 + $0x384] ss:$16 sps:$4 sm:$0xff]   ;;  %v417_v26 = vld [vmem:[#allocation2 + $0x8] sm:$0xff] }
 0x172   : > { %1873 = vmatprep.mubr.bf16.mxu1 %v4099_v27 }
 0x178   : > { %1585 = vmatmul.mubr.bf16.gmra.mrb[56].mxu0 %v4101_v28 }
 0x179   : > { %1874 = vmatmul.mubr.bf16.gmra.mrb[56].mxu1 %v4102_v29  ;;  %1592 = vmatprep.mubr.bf16.mxu0 %v4103_v30  ;;  %v4183_v29 = vld [vmem:[%s4749_s27 + $0x38c] ss:$16 sps:$4 sm:$0xff]  }
 0x17a   : > { %1881 = vmatprep.mubr.bf16.mxu1 %v4105_v31 }
 0x180   : > { %1593 = vmatmul.mubr.bf16.gmra.mrb[60].mxu0 %v4107_v32 }
 0x181   : > { %1882 = vmatmul.mubr.bf16.gmra.mrb[60].mxu1 %v4108_v33  ;;  %1600 = vmatprep.mubr.bf16.mxu0 %v4109_v34 }
 0x182   : > { %1889 = vmatprep.mubr.bf16.mxu1 %v4111_v35  ;;  %v418_v35 = vld [vmem:[#allocation2 + $0x10] sm:$0xff] }
 0x188   : > { %1601 = vmatmul.mubr.bf16.gmra.mrb[64].mxu0 %v4113_v36 }
 0x189   : > { %1890 = vmatmul.mubr.bf16.gmra.mrb[64].mxu1 %v4114_v37  ;;  %1608 = vmatprep.mubr.bf16.mxu0 %v4115_v38  ;;  %v4185_v38 = vld [vmem:[%s4749_s27 + $0x380] ss:$16 sps:$4 sm:$0xff]  }
 0x18a   : > { %1897 = vmatprep.mubr.bf16.mxu1 %v4117_v39 }
 0x190   : > { %1609 = vmatmul.mubr.bf16.gmra.mrb[68].mxu0 %v4119_v40 }
 0x191   : > { %1898 = vmatmul.mubr.bf16.gmra.mrb[68].mxu1 %v4120_v41  ;;  %1616 = vmatprep.mubr.bf16.mxu0 %v4121_v42  ;;  %v4186_v42 = vld [vmem:[%s4749_s27 + $0x388] ss:$16 sps:$4 sm:$0xff]  }
 0x192   : > { %1905 = vmatprep.mubr.bf16.mxu1 %v4123_v43  ;;  %v4187_v43 = vld [vmem:[%s4749_s27 + $0x3a4] ss:$16 sps:$4 sm:$0xff]  }
 0x198   : > { %1617 = vmatmul.mubr.bf16.gmra.mrb[72].mxu0 %v4125_v44  ;;  %v419_v44 = vld [vmem:[#allocation2 + $0x18] sm:$0xff] }
 0x199   : > { %1906 = vmatmul.mubr.bf16.gmra.mrb[72].mxu1 %v4126_v45  ;;  %1624 = vmatprep.mubr.bf16.mxu0 %v4127_v46 }
 0x19a   : > { %1913 = vmatprep.mubr.bf16.mxu1 %v4129_v47  ;;  %v4189_v47 = vld [vmem:[%s4749_s27 + $0x3ac] ss:$16 sps:$4 sm:$0xff]  }
 0x1a0   : > { %1625 = vmatmul.mubr.bf16.gmra.mrb[76].mxu0 %v4131_v48 }
 0x1a1   : > { %1914 = vmatmul.mubr.bf16.gmra.mrb[76].mxu1 %v4132_v49  ;;  %1632 = vmatprep.mubr.bf16.mxu0 %v4133_v50 }
 0x1a2   : > { %1921 = vmatprep.mubr.bf16.mxu1 %v4135_v51 }
 0x1a8   : > { %1633 = vmatmul.mubr.bf16.gmra.mrb[80].mxu0 %v4137_v52 }
 0x1a9   : > { %1922 = vmatmul.mubr.bf16.gmra.mrb[80].mxu1 %v4138_v53  ;;  %1640 = vmatprep.mubr.bf16.mxu0 %v4139_v54  ;;  %v420_v53 = vld [vmem:[#allocation2 + $0x20] sm:$0xff] }
 0x1aa   : > { %1929 = vmatprep.mubr.bf16.mxu1 %v4141_v55 }
 0x1b0   : > { %1641 = vmatmul.mubr.bf16.gmra.mrb[84].mxu0 %v4143_v56  ;;  %v4191_v56 = vld [vmem:[%s4749_s27 + $0x3a0] ss:$16 sps:$4 sm:$0xff]  }
 0x1b1   : > { %1930 = vmatmul.mubr.bf16.gmra.mrb[84].mxu1 %v4144_v57  ;;  %1648 = vmatprep.mubr.bf16.mxu0 %v4145_v58 }
 0x1b2   : > { %1937 = vmatprep.mubr.bf16.mxu1 %v4147_v59 }
 0x1b8   : > { %1649 = vmatmul.mubr.bf16.gmra.mrb[88].mxu0 %v4149_v60  ;;  %v4192_v60 = vld [vmem:[%s4749_s27 + $0x3a8] ss:$16 sps:$4 sm:$0xff]  }
 0x1b9   : > { %1938 = vmatmul.mubr.bf16.gmra.mrb[88].mxu1 %v4150_v61  ;;  %1656 = vmatprep.mubr.bf16.mxu0 %v4151_v62  ;;  %v4193_v61 = vld [vmem:[%s4749_s27 + $0x3c4] ss:$16 sps:$4 sm:$0xff]   ;;  %v421_v62 = vld [vmem:[#allocation2 + $0x28] sm:$0xff] }
 0x1ba   : > { %1945 = vmatprep.mubr.bf16.mxu1 %v4153_v63 }
 0x1c0   : > { %1657 = vmatmul.mubr.bf16.gmra.mrb[92].mxu0 %v4155_v0 }
 0x1c1   : > { %1946 = vmatmul.mubr.bf16.gmra.mrb[92].mxu1 %v4156_v1  ;;  %1664 = vmatprep.mubr.bf16.mxu0 %v4157_v2  ;;  %v4195_v1 = vld [vmem:[%s4749_s27 + $0x3cc] ss:$16 sps:$4 sm:$0xff]  }
 0x1c2   : > { %1953 = vmatprep.mubr.bf16.mxu1 %v4159_v3 }
 0x1c8   : > { %1665 = vmatmul.mubr.bf16.gmra.mrb[96].mxu0 %v4161_v4 }
 0x1c9   : > { %1954 = vmatmul.mubr.bf16.gmra.mrb[96].mxu1 %v4162_v5  ;;  %1672 = vmatprep.mubr.bf16.mxu0 %v4163_v6 }
 0x1ca   : > { %1961 = vmatprep.mubr.bf16.mxu1 %v4165_v7  ;;  %v422_v7 = vld [vmem:[#allocation2 + $0x30] sm:$0xff] }
 0x1d0   : > { %1673 = vmatmul.mubr.bf16.gmra.mrb[100].mxu0 %v4167_v8 }
 0x1d1   : > { %1962 = vmatmul.mubr.bf16.gmra.mrb[100].mxu1 %v4168_v9  ;;  %1680 = vmatprep.mubr.bf16.mxu0 %v4169_v10  ;;  %v4197_v10 = vld [vmem:[%s4749_s27 + $0x3c0] ss:$16 sps:$4 sm:$0xff]  }
 0x1d2   : > { %1969 = vmatprep.mubr.bf16.mxu1 %v4171_v11 }
 0x1d8   : > { %1681 = vmatmul.mubr.bf16.gmra.mrb[104].mxu0 %v4173_v12 }
 0x1d9   : > { %1970 = vmatmul.mubr.bf16.gmra.mrb[104].mxu1 %v4174_v13  ;;  %1688 = vmatprep.mubr.bf16.mxu0 %v4175_v14  ;;  %v4198_v14 = vld [vmem:[%s4749_s27 + $0x3c8] ss:$16 sps:$4 sm:$0xff]  }
 0x1da   : > { %1977 = vmatprep.mubr.bf16.mxu1 %v4177_v15  ;;  %v4199_v15 = vld [vmem:[%s4749_s27 + $0x3e4] ss:$16 sps:$4 sm:$0xff]  }
 0x1db   : > { %v1474_v16 = vpop.f32.mrb[0].mxu0 }
 0x1dc   : > { %v1763_v18 = vpop.f32.mrb[0].mxu1  ;;  %v1476_v19 = vpop.f32.mrb[1].mxu0 }
 0x1dd   : > { %v1764_v21 = vadd.f32 %v1763_v18, %v1474_v16  ;;  %v1765_v22 = vpop.f32.mrb[1].mxu1  ;;  %v1477_v23 = vpop.f32.mrb[2].mxu0  ;;  %v423_v16 = vld [vmem:[#allocation2 + $0x38] sm:$0xff] }
 0x1de   : > { %v1766_v27 = vpop.f32.mrb[2].mxu1  ;;  %v1479_v28 = vpop.f32.mrb[3].mxu0  ;;  %v4201_v19 = vld [vmem:[%s4749_s27 + $0x3ec] ss:$16 sps:$4 sm:$0xff]  }
 0x1df   : > { %v2018_v30 = vadd.f32 %v1764_v21, %v416_v17  ;;  %v1767_v31 = vadd.f32 %v1766_v27, %v1477_v23  ;;  %v1768_v32 = vpop.f32.mrb[3].mxu1  ;;  %v4203_v28 = vld [vmem:[%s4749_s27 + $0x3e0] ss:$16 sps:$4 sm:$0xff]  }
 0x1e0   : > { %1689 = vmatmul.mubr.bf16.gmra.mrb[108].mxu0 %v4179_v20  ;;  %v4204_v32 = vld [vmem:[%s4749_s27 + $0x3e8] ss:$16 sps:$4 sm:$0xff]  }
 0x1e1   : > { %2082 = vst [vmem:[#allocation2] sm:$0xff] %v2018_v30  ;;  %v2019_v33 = vadd.f32 %v1767_v31, %v417_v26  ;;  %1978 = vmatmul.mubr.bf16.gmra.mrb[108].mxu1 %v4180_v24  ;;  %1696 = vmatprep.mubr.bf16.mxu0 %v4181_v25  ;;  %v424_v25 = vld [vmem:[#allocation2 + $0x40] sm:$0xff] }
 0x1e2   : > { %1985 = vmatprep.mubr.bf16.mxu1 %v4183_v29 }
 0x1e3   : > { %2083 = vst [vmem:[#allocation2 + $0x8] sm:$0xff] %v2019_v33  ;;  %v1482_v34 = vpop.f32.mrb[4].mxu0  ;;  %v425_v33 = vld [vmem:[#allocation2 + $0x48] sm:$0xff] }
 0x1e4   : > { %v1771_v36 = vpop.f32.mrb[4].mxu1  ;;  %v1484_v37 = vpop.f32.mrb[5].mxu0 }
 0x1e5   : > { %v1772_v39 = vadd.f32 %v1771_v36, %v1482_v34  ;;  %v1773_v40 = vpop.f32.mrb[5].mxu1  ;;  %v1485_v41 = vpop.f32.mrb[6].mxu0 }
 0x1e6   : > { %v1774_v45 = vpop.f32.mrb[6].mxu1  ;;  %v1487_v46 = vpop.f32.mrb[7].mxu0 }
 0x1e7   : > { %v2020_v48 = vadd.f32 %v1772_v39, %v418_v35  ;;  %v1775_v49 = vadd.f32 %v1774_v45, %v1485_v41  ;;  %v1776_v50 = vpop.f32.mrb[7].mxu1  ;;  %v426_v41 = vld [vmem:[#allocation2 + $0x50] sm:$0xff] }
 0x1e8   : > { %1697 = vmatmul.mubr.bf16.gmra.mrb[112].mxu0 %v4185_v38 }
 0x1e9   : > { %2084 = vst [vmem:[#allocation2 + $0x10] sm:$0xff] %v2020_v48  ;;  %v2021_v51 = vadd.f32 %v1775_v49, %v419_v44  ;;  %1986 = vmatmul.mubr.bf16.gmra.mrb[112].mxu1 %v4186_v42  ;;  %1704 = vmatprep.mubr.bf16.mxu0 %v4187_v43 }
 0x1ea   : > { %1993 = vmatprep.mubr.bf16.mxu1 %v4189_v47  ;;  %v427_v47 = vld [vmem:[#allocation2 + $0x58] sm:$0xff] }
 0x1eb   : > { %2085 = vst [vmem:[#allocation2 + $0x18] sm:$0xff] %v2021_v51  ;;  %v1490_v52 = vpop.f32.mrb[8].mxu0 }
 0x1ec   : > { %v1779_v54 = vpop.f32.mrb[8].mxu1  ;;  %v1492_v55 = vpop.f32.mrb[9].mxu0 }
 0x1ed   : > { %v1780_v57 = vadd.f32 %v1779_v54, %v1490_v52  ;;  %v1781_v58 = vpop.f32.mrb[9].mxu1  ;;  %v1493_v59 = vpop.f32.mrb[10].mxu0  ;;  %v428_v55 = vld [vmem:[#allocation2 + $0x60] sm:$0xff] }
 0x1ee   : > { %v1782_v63 = vpop.f32.mrb[10].mxu1  ;;  %v1495_v0 = vpop.f32.mrb[11].mxu0 }
 0x1ef   : > { %v2022_v2 = vadd.f32 %v1780_v57, %v420_v53  ;;  %v1783_v3 = vadd.f32 %v1782_v63, %v1493_v59  ;;  %v1784_v4 = vpop.f32.mrb[11].mxu1 }
 0x1f0   : > { %1705 = vmatmul.mubr.bf16.gmra.mrb[116].mxu0 %v4191_v56 }
 0x1f1   : > { %2086 = vst [vmem:[#allocation2 + $0x20] sm:$0xff] %v2022_v2  ;;  %v2023_v5 = vadd.f32 %v1783_v3, %v421_v62  ;;  %1994 = vmatmul.mubr.bf16.gmra.mrb[116].mxu1 %v4192_v60  ;;  %1712 = vmatprep.mubr.bf16.mxu0 %v4193_v61  ;;  %v429_v61 = vld [vmem:[#allocation2 + $0x68] sm:$0xff] }
 0x1f2   : > { %2001 = vmatprep.mubr.bf16.mxu1 %v4195_v1 }
 0x1f3   : > { %2087 = vst [vmem:[#allocation2 + $0x28] sm:$0xff] %v2023_v5  ;;  %v1498_v6 = vpop.f32.mrb[12].mxu0  ;;  %v430_v5 = vld [vmem:[#allocation2 + $0x70] sm:$0xff] }
 0x1f4   : > { %v1787_v8 = vpop.f32.mrb[12].mxu1  ;;  %v1500_v9 = vpop.f32.mrb[13].mxu0 }
 0x1f5   : > { %v1788_v11 = vadd.f32 %v1787_v8, %v1498_v6  ;;  %v1789_v12 = vpop.f32.mrb[13].mxu1  ;;  %v1501_v13 = vpop.f32.mrb[14].mxu0 }
 0x1f6   : > { %v1790_v17 = vpop.f32.mrb[14].mxu1  ;;  %v1503_v18 = vpop.f32.mrb[15].mxu0 }
 0x1f7   : > { %v2024_v20 = vadd.f32 %v1788_v11, %v422_v7  ;;  %v1791_v21 = vadd.f32 %v1790_v17, %v1501_v13  ;;  %v1792_v22 = vpop.f32.mrb[15].mxu1  ;;  %v431_v11 = vld [vmem:[#allocation2 + $0x78] sm:$0xff] }
 0x1f8   : > { %1713 = vmatmul.mubr.bf16.gmra.mrb[120].mxu0 %v4197_v10 }
 0x1f9   : > { %2088 = vst [vmem:[#allocation2 + $0x30] sm:$0xff] %v2024_v20  ;;  %v2025_v23 = vadd.f32 %v1791_v21, %v423_v16  ;;  %2002 = vmatmul.mubr.bf16.gmra.mrb[120].mxu1 %v4198_v14  ;;  %1720 = vmatprep.mubr.bf16.mxu0 %v4199_v15 }
 0x1fa   : > { %2009 = vmatprep.mubr.bf16.mxu1 %v4201_v19  ;;  %v432_v19 = vld [vmem:[#allocation2 + $0x80] sm:$0xff] }
 0x1fb   : > { %2089 = vst [vmem:[#allocation2 + $0x38] sm:$0xff] %v2025_v23  ;;  %v1506_v24 = vpop.f32.mrb[16].mxu0 }
 0x1fc   : > { %v1795_v26 = vpop.f32.mrb[16].mxu1  ;;  %v1508_v27 = vpop.f32.mrb[17].mxu0 }
 0x1fd   : > { %v1796_v29 = vadd.f32 %v1795_v26, %v1506_v24  ;;  %v1797_v30 = vpop.f32.mrb[17].mxu1  ;;  %v1509_v31 = vpop.f32.mrb[18].mxu0 }
 0x1fe   : > { %v1798_v34 = vpop.f32.mrb[18].mxu1  ;;  %v1511_v35 = vpop.f32.mrb[19].mxu0 }
 0x1ff   : > { %v2026_v36 = vadd.f32 %v1796_v29, %v424_v25  ;;  %v1799_v37 = vadd.f32 %v1798_v34, %v1509_v31  ;;  %v1800_v38 = vpop.f32.mrb[19].mxu1  ;;  %v433_v25 = vld [vmem:[#allocation2 + $0x88] sm:$0xff] }
 0x200   : > { %1721 = vmatmul.mubr.bf16.gmra.mrb[124].mxu0 %v4203_v28 }
 0x201   : > { %2090 = vst [vmem:[#allocation2 + $0x40] sm:$0xff] %v2026_v36  ;;  %v2027_v39 = vadd.f32 %v1799_v37, %v425_v33  ;;  %2010 = vmatmul.mubr.bf16.gmra.mrb[124].mxu1 %v4204_v32  ;;  %v434_v33 = vld [vmem:[#allocation2 + $0x90] sm:$0xff] }
 0x203   : > { %2091 = vst [vmem:[#allocation2 + $0x48] sm:$0xff] %v2027_v39  ;;  %v1514_v40 = vpop.f32.mrb[20].mxu0  ;;  %v435_v39 = vld [vmem:[#allocation2 + $0x98] sm:$0xff] }
 0x204   : > { %v1803_v42 = vpop.f32.mrb[20].mxu1  ;;  %v1516_v43 = vpop.f32.mrb[21].mxu0 }
 0x205   : > { %v1804_v44 = vadd.f32 %v1803_v42, %v1514_v40  ;;  %v1805_v45 = vpop.f32.mrb[21].mxu1  ;;  %v1517_v46 = vpop.f32.mrb[22].mxu0 }
 0x206   : > { %v1806_v48 = vpop.f32.mrb[22].mxu1  ;;  %v1519_v49 = vpop.f32.mrb[23].mxu0 }
 0x207   : > { %v2028_v50 = vadd.f32 %v1804_v44, %v426_v41  ;;  %v1807_v51 = vadd.f32 %v1806_v48, %v1517_v46  ;;  %v1808_v52 = vpop.f32.mrb[23].mxu1 }
 0x209   : > { %2092 = vst [vmem:[#allocation2 + $0x50] sm:$0xff] %v2028_v50  ;;  %v2029_v53 = vadd.f32 %v1807_v51, %v427_v47  ;;  %v436_v47 = vld [vmem:[#allocation2 + $0xa0] sm:$0xff] }
 0x20b   : > { %2093 = vst [vmem:[#allocation2 + $0x58] sm:$0xff] %v2029_v53  ;;  %v1522_v54 = vpop.f32.mrb[24].mxu0  ;;  %v437_v53 = vld [vmem:[#allocation2 + $0xa8] sm:$0xff] }
 0x20c   : > { %v1811_v56 = vpop.f32.mrb[24].mxu1  ;;  %v1524_v57 = vpop.f32.mrb[25].mxu0 }
 0x20d   : > { %v1812_v58 = vadd.f32 %v1811_v56, %v1522_v54  ;;  %v1813_v59 = vpop.f32.mrb[25].mxu1  ;;  %v1525_v60 = vpop.f32.mrb[26].mxu0 }
 0x20e   : > { %v1814_v62 = vpop.f32.mrb[26].mxu1  ;;  %v1527_v63 = vpop.f32.mrb[27].mxu0 }
 0x20f   : > { %v2030_v0 = vadd.f32 %v1812_v58, %v428_v55  ;;  %v1815_v1 = vadd.f32 %v1814_v62, %v1525_v60  ;;  %v1816_v2 = vpop.f32.mrb[27].mxu1 }
 0x211   : > { %2094 = vst [vmem:[#allocation2 + $0x60] sm:$0xff] %v2030_v0  ;;  %v2031_v3 = vadd.f32 %v1815_v1, %v429_v61  ;;  %v438_v61 = vld [vmem:[#allocation2 + $0xb0] sm:$0xff] }
 0x213   : > { %2095 = vst [vmem:[#allocation2 + $0x68] sm:$0xff] %v2031_v3  ;;  %v1530_v4 = vpop.f32.mrb[28].mxu0  ;;  %v439_v3 = vld [vmem:[#allocation2 + $0xb8] sm:$0xff] }
 0x214   : > { %v1819_v6 = vpop.f32.mrb[28].mxu1  ;;  %v1532_v7 = vpop.f32.mrb[29].mxu0 }
 0x215   : > { %v1820_v8 = vadd.f32 %v1819_v6, %v1530_v4  ;;  %v1821_v9 = vpop.f32.mrb[29].mxu1  ;;  %v1533_v10 = vpop.f32.mrb[30].mxu0 }
 0x216   : > { %v1822_v12 = vpop.f32.mrb[30].mxu1  ;;  %v1535_v13 = vpop.f32.mrb[31].mxu0 }
 0x217   : > { %v2032_v14 = vadd.f32 %v1820_v8, %v430_v5  ;;  %v1823_v15 = vadd.f32 %v1822_v12, %v1533_v10  ;;  %v1824_v16 = vpop.f32.mrb[31].mxu1 }
 0x219   : > { %2096 = vst [vmem:[#allocation2 + $0x70] sm:$0xff] %v2032_v14  ;;  %v2033_v17 = vadd.f32 %v1823_v15, %v431_v11  ;;  %v440_v11 = vld [vmem:[#allocation2 + $0xc0] sm:$0xff] }
 0x21b   : > { %2097 = vst [vmem:[#allocation2 + $0x78] sm:$0xff] %v2033_v17  ;;  %v1538_v18 = vpop.f32.mrb[32].mxu0  ;;  %v441_v17 = vld [vmem:[#allocation2 + $0xc8] sm:$0xff] }
 0x21c   : > { %v1827_v20 = vpop.f32.mrb[32].mxu1  ;;  %v1540_v21 = vpop.f32.mrb[33].mxu0 }
 0x21d   : > { %v1828_v22 = vadd.f32 %v1827_v20, %v1538_v18  ;;  %v1829_v23 = vpop.f32.mrb[33].mxu1  ;;  %v1541_v24 = vpop.f32.mrb[34].mxu0 }
 0x21e   : > { %v1830_v26 = vpop.f32.mrb[34].mxu1  ;;  %v1543_v27 = vpop.f32.mrb[35].mxu0 }
 0x21f   : > { %v2034_v28 = vadd.f32 %v1828_v22, %v432_v19  ;;  %v1831_v29 = vadd.f32 %v1830_v26, %v1541_v24  ;;  %v1832_v30 = vpop.f32.mrb[35].mxu1 }
 0x221   : > { %2098 = vst [vmem:[#allocation2 + $0x80] sm:$0xff] %v2034_v28  ;;  %v2035_v31 = vadd.f32 %v1831_v29, %v433_v25  ;;  %v442_v25 = vld [vmem:[#allocation2 + $0xd0] sm:$0xff] }
 0x223   : > { %2099 = vst [vmem:[#allocation2 + $0x88] sm:$0xff] %v2035_v31  ;;  %v1546_v32 = vpop.f32.mrb[36].mxu0  ;;  %v443_v31 = vld [vmem:[#allocation2 + $0xd8] sm:$0xff] }
 0x224   : > { %v1835_v34 = vpop.f32.mrb[36].mxu1  ;;  %v1548_v35 = vpop.f32.mrb[37].mxu0 }
 0x225   : > { %v1836_v36 = vadd.f32 %v1835_v34, %v1546_v32  ;;  %v1837_v37 = vpop.f32.mrb[37].mxu1  ;;  %v1549_v38 = vpop.f32.mrb[38].mxu0 }
 0x226   : > { %v1838_v40 = vpop.f32.mrb[38].mxu1  ;;  %v1551_v41 = vpop.f32.mrb[39].mxu0 }
 0x227   : > { %v2036_v42 = vadd.f32 %v1836_v36, %v434_v33  ;;  %v1839_v43 = vadd.f32 %v1838_v40, %v1549_v38  ;;  %v1840_v44 = vpop.f32.mrb[39].mxu1 }
 0x229   : > { %2100 = vst [vmem:[#allocation2 + $0x90] sm:$0xff] %v2036_v42  ;;  %v2037_v45 = vadd.f32 %v1839_v43, %v435_v39  ;;  %v444_v39 = vld [vmem:[#allocation2 + $0xe0] sm:$0xff] }
 0x22b   : > { %2101 = vst [vmem:[#allocation2 + $0x98] sm:$0xff] %v2037_v45  ;;  %v1554_v46 = vpop.f32.mrb[40].mxu0  ;;  %v445_v45 = vld [vmem:[#allocation2 + $0xe8] sm:$0xff] }
 0x22c   : > { %v1843_v48 = vpop.f32.mrb[40].mxu1  ;;  %v1556_v49 = vpop.f32.mrb[41].mxu0 }
 0x22d   : > { %v1844_v50 = vadd.f32 %v1843_v48, %v1554_v46  ;;  %v1845_v51 = vpop.f32.mrb[41].mxu1  ;;  %v1557_v52 = vpop.f32.mrb[42].mxu0 }
 0x22e   : > { %v1846_v54 = vpop.f32.mrb[42].mxu1  ;;  %v1559_v55 = vpop.f32.mrb[43].mxu0 }
 0x22f   : > { %v2038_v56 = vadd.f32 %v1844_v50, %v436_v47  ;;  %v1847_v57 = vadd.f32 %v1846_v54, %v1557_v52  ;;  %v1848_v58 = vpop.f32.mrb[43].mxu1 }
 0x231   : > { %2102 = vst [vmem:[#allocation2 + $0xa0] sm:$0xff] %v2038_v56  ;;  %v2039_v59 = vadd.f32 %v1847_v57, %v437_v53  ;;  %v446_v53 = vld [vmem:[#allocation2 + $0xf0] sm:$0xff] }
 0x233   : > { %2103 = vst [vmem:[#allocation2 + $0xa8] sm:$0xff] %v2039_v59  ;;  %v1562_v60 = vpop.f32.mrb[44].mxu0  ;;  %v447_v59 = vld [vmem:[#allocation2 + $0xf8] sm:$0xff] }
 0x234   : > { %v1851_v62 = vpop.f32.mrb[44].mxu1  ;;  %v1564_v63 = vpop.f32.mrb[45].mxu0 }
 0x235   : > { %v1852_v0 = vadd.f32 %v1851_v62, %v1562_v60  ;;  %v1853_v1 = vpop.f32.mrb[45].mxu1  ;;  %v1565_v2 = vpop.f32.mrb[46].mxu0 }
 0x236   : > { %v1854_v4 = vpop.f32.mrb[46].mxu1  ;;  %v1567_v5 = vpop.f32.mrb[47].mxu0 }
 0x237   : > { %v2040_v6 = vadd.f32 %v1852_v0, %v438_v61  ;;  %v1855_v7 = vadd.f32 %v1854_v4, %v1565_v2  ;;  %v1856_v8 = vpop.f32.mrb[47].mxu1 }
 0x239   : > { %2104 = vst [vmem:[#allocation2 + $0xb0] sm:$0xff] %v2040_v6  ;;  %v2041_v9 = vadd.f32 %v1855_v7, %v439_v3  ;;  %v448_v3 = vld [vmem:[#allocation2 + $0x100] sm:$0xff] }
 0x23b   : > { %2105 = vst [vmem:[#allocation2 + $0xb8] sm:$0xff] %v2041_v9  ;;  %v1570_v10 = vpop.f32.mrb[48].mxu0  ;;  %v449_v9 = vld [vmem:[#allocation2 + $0x108] sm:$0xff] }
 0x23c   : > { %v1859_v12 = vpop.f32.mrb[48].mxu1  ;;  %v1572_v13 = vpop.f32.mrb[49].mxu0 }
 0x23d   : > { %v1860_v14 = vadd.f32 %v1859_v12, %v1570_v10  ;;  %v1861_v15 = vpop.f32.mrb[49].mxu1  ;;  %v1573_v16 = vpop.f32.mrb[50].mxu0 }
 0x23e   : > { %v1862_v18 = vpop.f32.mrb[50].mxu1  ;;  %v1575_v19 = vpop.f32.mrb[51].mxu0 }
 0x23f   : > { %v2042_v20 = vadd.f32 %v1860_v14, %v440_v11  ;;  %v1863_v21 = vadd.f32 %v1862_v18, %v1573_v16  ;;  %v1864_v22 = vpop.f32.mrb[51].mxu1 }
 0x241   : > { %2106 = vst [vmem:[#allocation2 + $0xc0] sm:$0xff] %v2042_v20  ;;  %v2043_v23 = vadd.f32 %v1863_v21, %v441_v17  ;;  %v450_v17 = vld [vmem:[#allocation2 + $0x110] sm:$0xff] }
 0x243   : > { %2107 = vst [vmem:[#allocation2 + $0xc8] sm:$0xff] %v2043_v23  ;;  %v1578_v24 = vpop.f32.mrb[52].mxu0  ;;  %v451_v23 = vld [vmem:[#allocation2 + $0x118] sm:$0xff] }
 0x244   : > { %v1867_v26 = vpop.f32.mrb[52].mxu1  ;;  %v1580_v27 = vpop.f32.mrb[53].mxu0 }
 0x245   : > { %v1868_v28 = vadd.f32 %v1867_v26, %v1578_v24  ;;  %v1869_v29 = vpop.f32.mrb[53].mxu1  ;;  %v1581_v30 = vpop.f32.mrb[54].mxu0 }
 0x246   : > { %v1870_v32 = vpop.f32.mrb[54].mxu1  ;;  %v1583_v33 = vpop.f32.mrb[55].mxu0 }
 0x247   : > { %v2044_v34 = vadd.f32 %v1868_v28, %v442_v25  ;;  %v1871_v35 = vadd.f32 %v1870_v32, %v1581_v30  ;;  %v1872_v36 = vpop.f32.mrb[55].mxu1 }
 0x249   : > { %2108 = vst [vmem:[#allocation2 + $0xd0] sm:$0xff] %v2044_v34  ;;  %v2045_v37 = vadd.f32 %v1871_v35, %v443_v31  ;;  %v452_v31 = vld [vmem:[#allocation2 + $0x120] sm:$0xff] }
 0x24b   : > { %2109 = vst [vmem:[#allocation2 + $0xd8] sm:$0xff] %v2045_v37  ;;  %v1586_v38 = vpop.f32.mrb[56].mxu0  ;;  %v453_v37 = vld [vmem:[#allocation2 + $0x128] sm:$0xff] }
 0x24c   : > { %v1875_v40 = vpop.f32.mrb[56].mxu1  ;;  %v1588_v41 = vpop.f32.mrb[57].mxu0 }
 0x24d   : > { %v1876_v42 = vadd.f32 %v1875_v40, %v1586_v38  ;;  %v1877_v43 = vpop.f32.mrb[57].mxu1  ;;  %v1589_v44 = vpop.f32.mrb[58].mxu0 }
 0x24e   : > { %v1878_v46 = vpop.f32.mrb[58].mxu1  ;;  %v1591_v47 = vpop.f32.mrb[59].mxu0 }
 0x24f   : > { %v2046_v48 = vadd.f32 %v1876_v42, %v444_v39  ;;  %v1879_v49 = vadd.f32 %v1878_v46, %v1589_v44  ;;  %v1880_v50 = vpop.f32.mrb[59].mxu1 }
 0x251   : > { %2110 = vst [vmem:[#allocation2 + $0xe0] sm:$0xff] %v2046_v48  ;;  %v2047_v51 = vadd.f32 %v1879_v49, %v445_v45  ;;  %v454_v45 = vld [vmem:[#allocation2 + $0x130] sm:$0xff] }
 0x253   : > { %2111 = vst [vmem:[#allocation2 + $0xe8] sm:$0xff] %v2047_v51  ;;  %v1594_v52 = vpop.f32.mrb[60].mxu0  ;;  %v455_v51 = vld [vmem:[#allocation2 + $0x138] sm:$0xff] }
 0x254   : > { %v1883_v54 = vpop.f32.mrb[60].mxu1  ;;  %v1596_v55 = vpop.f32.mrb[61].mxu0 }
 0x255   : > { %v1884_v56 = vadd.f32 %v1883_v54, %v1594_v52  ;;  %v1885_v57 = vpop.f32.mrb[61].mxu1  ;;  %v1597_v58 = vpop.f32.mrb[62].mxu0 }
 0x256   : > { %v1886_v60 = vpop.f32.mrb[62].mxu1  ;;  %v1599_v61 = vpop.f32.mrb[63].mxu0 }
 0x257   : > { %v2048_v62 = vadd.f32 %v1884_v56, %v446_v53  ;;  %v1887_v63 = vadd.f32 %v1886_v60, %v1597_v58  ;;  %v1888_v0 = vpop.f32.mrb[63].mxu1 }
 0x259   : > { %2112 = vst [vmem:[#allocation2 + $0xf0] sm:$0xff] %v2048_v62  ;;  %v2049_v1 = vadd.f32 %v1887_v63, %v447_v59  ;;  %v456_v59 = vld [vmem:[#allocation2 + $0x140] sm:$0xff] }
 0x25b   : > { %2113 = vst [vmem:[#allocation2 + $0xf8] sm:$0xff] %v2049_v1  ;;  %v1602_v2 = vpop.f32.mrb[64].mxu0  ;;  %v457_v1 = vld [vmem:[#allocation2 + $0x148] sm:$0xff] }
 0x25c   : > { %v1891_v4 = vpop.f32.mrb[64].mxu1  ;;  %v1604_v5 = vpop.f32.mrb[65].mxu0 }
 0x25d   : > { %v1892_v6 = vadd.f32 %v1891_v4, %v1602_v2  ;;  %v1893_v7 = vpop.f32.mrb[65].mxu1  ;;  %v1605_v8 = vpop.f32.mrb[66].mxu0 }
 0x25e   : > { %v1894_v10 = vpop.f32.mrb[66].mxu1  ;;  %v1607_v11 = vpop.f32.mrb[67].mxu0 }
 0x25f   : > { %v2050_v12 = vadd.f32 %v1892_v6, %v448_v3  ;;  %v1895_v13 = vadd.f32 %v1894_v10, %v1605_v8  ;;  %v1896_v14 = vpop.f32.mrb[67].mxu1 }
 0x261   : > { %2114 = vst [vmem:[#allocation2 + $0x100] sm:$0xff] %v2050_v12  ;;  %v2051_v15 = vadd.f32 %v1895_v13, %v449_v9  ;;  %v458_v9 = vld [vmem:[#allocation2 + $0x150] sm:$0xff] }
 0x263   : > { %2115 = vst [vmem:[#allocation2 + $0x108] sm:$0xff] %v2051_v15  ;;  %v1610_v16 = vpop.f32.mrb[68].mxu0  ;;  %v459_v15 = vld [vmem:[#allocation2 + $0x158] sm:$0xff] }
 0x264   : > { %v1899_v18 = vpop.f32.mrb[68].mxu1  ;;  %v1612_v19 = vpop.f32.mrb[69].mxu0 }
 0x265   : > { %v1900_v20 = vadd.f32 %v1899_v18, %v1610_v16  ;;  %v1901_v21 = vpop.f32.mrb[69].mxu1  ;;  %v1613_v22 = vpop.f32.mrb[70].mxu0 }
 0x266   : > { %v1902_v24 = vpop.f32.mrb[70].mxu1  ;;  %v1615_v25 = vpop.f32.mrb[71].mxu0 }
 0x267   : > { %v2052_v26 = vadd.f32 %v1900_v20, %v450_v17  ;;  %v1903_v27 = vadd.f32 %v1902_v24, %v1613_v22  ;;  %v1904_v28 = vpop.f32.mrb[71].mxu1 }
 0x269   : > { %2116 = vst [vmem:[#allocation2 + $0x110] sm:$0xff] %v2052_v26  ;;  %v2053_v29 = vadd.f32 %v1903_v27, %v451_v23  ;;  %v460_v23 = vld [vmem:[#allocation2 + $0x160] sm:$0xff] }
 0x26b   : > { %2117 = vst [vmem:[#allocation2 + $0x118] sm:$0xff] %v2053_v29  ;;  %v1618_v30 = vpop.f32.mrb[72].mxu0  ;;  %v461_v29 = vld [vmem:[#allocation2 + $0x168] sm:$0xff] }
 0x26c   : > { %v1907_v32 = vpop.f32.mrb[72].mxu1  ;;  %v1620_v33 = vpop.f32.mrb[73].mxu0 }
 0x26d   : > { %v1908_v34 = vadd.f32 %v1907_v32, %v1618_v30  ;;  %v1909_v35 = vpop.f32.mrb[73].mxu1  ;;  %v1621_v36 = vpop.f32.mrb[74].mxu0 }
 0x26e   : > { %v1910_v38 = vpop.f32.mrb[74].mxu1  ;;  %v1623_v39 = vpop.f32.mrb[75].mxu0 }
 0x26f   : > { %v2054_v40 = vadd.f32 %v1908_v34, %v452_v31  ;;  %v1911_v41 = vadd.f32 %v1910_v38, %v1621_v36  ;;  %v1912_v42 = vpop.f32.mrb[75].mxu1 }
 0x271   : > { %2118 = vst [vmem:[#allocation2 + $0x120] sm:$0xff] %v2054_v40  ;;  %v2055_v43 = vadd.f32 %v1911_v41, %v453_v37  ;;  %v462_v37 = vld [vmem:[#allocation2 + $0x170] sm:$0xff] }
 0x273   : > { %2119 = vst [vmem:[#allocation2 + $0x128] sm:$0xff] %v2055_v43  ;;  %v1626_v44 = vpop.f32.mrb[76].mxu0  ;;  %v463_v43 = vld [vmem:[#allocation2 + $0x178] sm:$0xff] }
 0x274   : > { %v1915_v46 = vpop.f32.mrb[76].mxu1  ;;  %v1628_v47 = vpop.f32.mrb[77].mxu0 }
 0x275   : > { %v1916_v48 = vadd.f32 %v1915_v46, %v1626_v44  ;;  %v1917_v49 = vpop.f32.mrb[77].mxu1  ;;  %v1629_v50 = vpop.f32.mrb[78].mxu0 }
 0x276   : > { %v1918_v52 = vpop.f32.mrb[78].mxu1  ;;  %v1631_v53 = vpop.f32.mrb[79].mxu0 }
 0x277   : > { %v2056_v54 = vadd.f32 %v1916_v48, %v454_v45  ;;  %v1919_v55 = vadd.f32 %v1918_v52, %v1629_v50  ;;  %v1920_v56 = vpop.f32.mrb[79].mxu1 }
 0x279   : > { %2120 = vst [vmem:[#allocation2 + $0x130] sm:$0xff] %v2056_v54  ;;  %v2057_v57 = vadd.f32 %v1919_v55, %v455_v51  ;;  %v464_v51 = vld [vmem:[#allocation2 + $0x180] sm:$0xff] }
 0x27b   : > { %2121 = vst [vmem:[#allocation2 + $0x138] sm:$0xff] %v2057_v57  ;;  %v1634_v58 = vpop.f32.mrb[80].mxu0  ;;  %v465_v57 = vld [vmem:[#allocation2 + $0x188] sm:$0xff] }
 0x27c   : > { %v1923_v60 = vpop.f32.mrb[80].mxu1  ;;  %v1636_v61 = vpop.f32.mrb[81].mxu0 }
 0x27d   : > { %v1924_v62 = vadd.f32 %v1923_v60, %v1634_v58  ;;  %v1925_v63 = vpop.f32.mrb[81].mxu1  ;;  %v1637_v0 = vpop.f32.mrb[82].mxu0 }
 0x27e   : > { %v1926_v2 = vpop.f32.mrb[82].mxu1  ;;  %v1639_v3 = vpop.f32.mrb[83].mxu0 }
 0x27f   : > { %v2058_v4 = vadd.f32 %v1924_v62, %v456_v59  ;;  %v1927_v5 = vadd.f32 %v1926_v2, %v1637_v0  ;;  %v1928_v6 = vpop.f32.mrb[83].mxu1 }
 0x281   : > { %2122 = vst [vmem:[#allocation2 + $0x140] sm:$0xff] %v2058_v4  ;;  %v2059_v7 = vadd.f32 %v1927_v5, %v457_v1  ;;  %v466_v1 = vld [vmem:[#allocation2 + $0x190] sm:$0xff] }
 0x283   : > { %2123 = vst [vmem:[#allocation2 + $0x148] sm:$0xff] %v2059_v7  ;;  %v1642_v8 = vpop.f32.mrb[84].mxu0  ;;  %v467_v7 = vld [vmem:[#allocation2 + $0x198] sm:$0xff] }
 0x284   : > { %v1931_v10 = vpop.f32.mrb[84].mxu1  ;;  %v1644_v11 = vpop.f32.mrb[85].mxu0 }
 0x285   : > { %v1932_v12 = vadd.f32 %v1931_v10, %v1642_v8  ;;  %v1933_v13 = vpop.f32.mrb[85].mxu1  ;;  %v1645_v14 = vpop.f32.mrb[86].mxu0 }
 0x286   : > { %v1934_v16 = vpop.f32.mrb[86].mxu1  ;;  %v1647_v17 = vpop.f32.mrb[87].mxu0 }
 0x287   : > { %v2060_v18 = vadd.f32 %v1932_v12, %v458_v9  ;;  %v1935_v19 = vadd.f32 %v1934_v16, %v1645_v14  ;;  %v1936_v20 = vpop.f32.mrb[87].mxu1 }
 0x289   : > { %2124 = vst [vmem:[#allocation2 + $0x150] sm:$0xff] %v2060_v18  ;;  %v2061_v21 = vadd.f32 %v1935_v19, %v459_v15  ;;  %v468_v15 = vld [vmem:[#allocation2 + $0x1a0] sm:$0xff] }
 0x28b   : > { %2125 = vst [vmem:[#allocation2 + $0x158] sm:$0xff] %v2061_v21  ;;  %v1650_v22 = vpop.f32.mrb[88].mxu0  ;;  %v469_v21 = vld [vmem:[#allocation2 + $0x1a8] sm:$0xff] }
 0x28c   : > { %v1939_v24 = vpop.f32.mrb[88].mxu1  ;;  %v1652_v25 = vpop.f32.mrb[89].mxu0 }
 0x28d   : > { %v1940_v26 = vadd.f32 %v1939_v24, %v1650_v22  ;;  %v1941_v27 = vpop.f32.mrb[89].mxu1  ;;  %v1653_v28 = vpop.f32.mrb[90].mxu0 }
 0x28e   : > { %v1942_v30 = vpop.f32.mrb[90].mxu1  ;;  %v1655_v31 = vpop.f32.mrb[91].mxu0 }
 0x28f   : > { %v2062_v32 = vadd.f32 %v1940_v26, %v460_v23  ;;  %v1943_v33 = vadd.f32 %v1942_v30, %v1653_v28  ;;  %v1944_v34 = vpop.f32.mrb[91].mxu1 }
 0x291   : > { %2126 = vst [vmem:[#allocation2 + $0x160] sm:$0xff] %v2062_v32  ;;  %v2063_v35 = vadd.f32 %v1943_v33, %v461_v29  ;;  %v470_v29 = vld [vmem:[#allocation2 + $0x1b0] sm:$0xff] }
 0x293   : > { %2127 = vst [vmem:[#allocation2 + $0x168] sm:$0xff] %v2063_v35  ;;  %v1658_v36 = vpop.f32.mrb[92].mxu0  ;;  %v471_v35 = vld [vmem:[#allocation2 + $0x1b8] sm:$0xff] }
 0x294   : > { %v1947_v38 = vpop.f32.mrb[92].mxu1  ;;  %v1660_v39 = vpop.f32.mrb[93].mxu0 }
 0x295   : > { %v1948_v40 = vadd.f32 %v1947_v38, %v1658_v36  ;;  %v1949_v41 = vpop.f32.mrb[93].mxu1  ;;  %v1661_v42 = vpop.f32.mrb[94].mxu0 }
 0x296   : > { %v1950_v44 = vpop.f32.mrb[94].mxu1  ;;  %v1663_v45 = vpop.f32.mrb[95].mxu0 }
 0x297   : > { %v2064_v46 = vadd.f32 %v1948_v40, %v462_v37  ;;  %v1951_v47 = vadd.f32 %v1950_v44, %v1661_v42  ;;  %v1952_v48 = vpop.f32.mrb[95].mxu1 }
 0x299   : > { %2128 = vst [vmem:[#allocation2 + $0x170] sm:$0xff] %v2064_v46  ;;  %v2065_v49 = vadd.f32 %v1951_v47, %v463_v43  ;;  %v472_v43 = vld [vmem:[#allocation2 + $0x1c0] sm:$0xff] }
 0x29b   : > { %2129 = vst [vmem:[#allocation2 + $0x178] sm:$0xff] %v2065_v49  ;;  %v1666_v50 = vpop.f32.mrb[96].mxu0  ;;  %v473_v49 = vld [vmem:[#allocation2 + $0x1c8] sm:$0xff] }
 0x29c   : > { %v1955_v52 = vpop.f32.mrb[96].mxu1  ;;  %v1668_v53 = vpop.f32.mrb[97].mxu0 }
 0x29d   : > { %v1956_v54 = vadd.f32 %v1955_v52, %v1666_v50  ;;  %v1957_v55 = vpop.f32.mrb[97].mxu1  ;;  %v1669_v56 = vpop.f32.mrb[98].mxu0 }
 0x29e   : > { %v1958_v58 = vpop.f32.mrb[98].mxu1  ;;  %v1671_v59 = vpop.f32.mrb[99].mxu0 }
 0x29f   : > { %v2066_v60 = vadd.f32 %v1956_v54, %v464_v51  ;;  %v1959_v61 = vadd.f32 %v1958_v58, %v1669_v56  ;;  %v1960_v62 = vpop.f32.mrb[99].mxu1 }
 0x2a1   : > { %2130 = vst [vmem:[#allocation2 + $0x180] sm:$0xff] %v2066_v60  ;;  %v2067_v63 = vadd.f32 %v1959_v61, %v465_v57  ;;  %v474_v57 = vld [vmem:[#allocation2 + $0x1d0] sm:$0xff] }
 0x2a3   : > { %2131 = vst [vmem:[#allocation2 + $0x188] sm:$0xff] %v2067_v63  ;;  %v1674_v0 = vpop.f32.mrb[100].mxu0  ;;  %v475_v63 = vld [vmem:[#allocation2 + $0x1d8] sm:$0xff] }
 0x2a4   : > { %v1963_v2 = vpop.f32.mrb[100].mxu1  ;;  %v1676_v3 = vpop.f32.mrb[101].mxu0 }
 0x2a5   : > { %v1964_v4 = vadd.f32 %v1963_v2, %v1674_v0  ;;  %v1965_v5 = vpop.f32.mrb[101].mxu1  ;;  %v1677_v6 = vpop.f32.mrb[102].mxu0 }
 0x2a6   : > { %v1966_v8 = vpop.f32.mrb[102].mxu1  ;;  %v1679_v9 = vpop.f32.mrb[103].mxu0 }
 0x2a7   : > { %v2068_v10 = vadd.f32 %v1964_v4, %v466_v1  ;;  %v1967_v11 = vadd.f32 %v1966_v8, %v1677_v6  ;;  %v1968_v12 = vpop.f32.mrb[103].mxu1 }
 0x2a9   : > { %2132 = vst [vmem:[#allocation2 + $0x190] sm:$0xff] %v2068_v10  ;;  %v2069_v13 = vadd.f32 %v1967_v11, %v467_v7  ;;  %v476_v7 = vld [vmem:[#allocation2 + $0x1e0] sm:$0xff] }
 0x2ab   : > { %2133 = vst [vmem:[#allocation2 + $0x198] sm:$0xff] %v2069_v13  ;;  %v1682_v14 = vpop.f32.mrb[104].mxu0  ;;  %v477_v13 = vld [vmem:[#allocation2 + $0x1e8] sm:$0xff] }
 0x2ac   : > { %v1971_v16 = vpop.f32.mrb[104].mxu1  ;;  %v1684_v17 = vpop.f32.mrb[105].mxu0 }
 0x2ad   : > { %v1972_v18 = vadd.f32 %v1971_v16, %v1682_v14  ;;  %v1973_v19 = vpop.f32.mrb[105].mxu1  ;;  %v1685_v20 = vpop.f32.mrb[106].mxu0 }
 0x2ae   : > { %v1974_v22 = vpop.f32.mrb[106].mxu1  ;;  %v1687_v23 = vpop.f32.mrb[107].mxu0 }
 0x2af   : > { %v2070_v24 = vadd.f32 %v1972_v18, %v468_v15  ;;  %v1975_v25 = vadd.f32 %v1974_v22, %v1685_v20  ;;  %v1976_v26 = vpop.f32.mrb[107].mxu1 }
 0x2b1   : > { %2134 = vst [vmem:[#allocation2 + $0x1a0] sm:$0xff] %v2070_v24  ;;  %v2071_v27 = vadd.f32 %v1975_v25, %v469_v21  ;;  %v478_v21 = vld [vmem:[#allocation2 + $0x1f0] sm:$0xff] }
 0x2b3   : > { %2135 = vst [vmem:[#allocation2 + $0x1a8] sm:$0xff] %v2071_v27  ;;  %v1690_v28 = vpop.f32.mrb[108].mxu0  ;;  %v479_v27 = vld [vmem:[#allocation2 + $0x1f8] sm:$0xff] }
 0x2b4   : > { %v1979_v30 = vpop.f32.mrb[108].mxu1  ;;  %v1692_v31 = vpop.f32.mrb[109].mxu0 }
 0x2b5   : > { %v1980_v32 = vadd.f32 %v1979_v30, %v1690_v28  ;;  %v1981_v33 = vpop.f32.mrb[109].mxu1  ;;  %v1693_v34 = vpop.f32.mrb[110].mxu0 }
 0x2b6   : > { %v1982_v36 = vpop.f32.mrb[110].mxu1  ;;  %v1695_v37 = vpop.f32.mrb[111].mxu0 }
 0x2b7   : > { %v2072_v38 = vadd.f32 %v1980_v32, %v470_v29  ;;  %v1983_v39 = vadd.f32 %v1982_v36, %v1693_v34  ;;  %v1984_v40 = vpop.f32.mrb[111].mxu1  ;;  %v4205_v34 = vld [vmem:[#allocation9] sm:$0xff] (!%p3367_p3)   ;;  %v4207_v36 = vld [vmem:[#allocation9 + $0x10] sm:$0xff] (!%p3367_p3)   ;;  %v4208_v37 = vld [vmem:[#allocation9 + $0x18] sm:$0xff] (!%p3367_p3)  }
 0x2b8   : > { %3743 = vmatprep.subr.bf16.mxu0 (!%p3367_p3), %v4205_v34  ;;  %3823 = vmatprep.subr.bf16.mxu1 (!%p3367_p3), %v4205_v34  ;;  %v5029_v40 = vld [vmem:[#allocation8] ss:$0 sm:$0xff] (!%p3367_p3) }
 0x2b9   : > { %2136 = vst [vmem:[#allocation2 + $0x1b0] sm:$0xff] %v2072_v38  ;;  %v2073_v41 = vadd.f32 %v1983_v39, %v471_v35  ;;  %v4206_v35 = vld [vmem:[#allocation9 + $0x8] sm:$0xff] (!%p3367_p3)   ;;  %3744 = vmatpush3.bf16.msra.mxu0 (!%p3367_p3), %v4205_v34  ;;  %3831 = vmatpush3.bf16.msra.mxu1 (!%p3367_p3), %v4205_v34  ;;  %v2150_v38 = vld [vmem:[#allocation2] sm:$0xff] (!%p3367_p3) }
 0x2ba   : > { %3745 = vmatprep.subr.bf16.mxu0 (!%p3367_p3), %v4206_v35  ;;  %3824 = vmatprep.subr.bf16.mxu1 (!%p3367_p3), %v4206_v35  ;;  %v2151_v39 = vld [vmem:[#allocation2 + $0x8] sm:$0xff] (!%p3367_p3) }
 0x2bb   : > { %2137 = vst [vmem:[#allocation2 + $0x1b8] sm:$0xff] %v2073_v41  ;;  %v1698_v42 = vpop.f32.mrb[112].mxu0  ;;  %v2221_v41 = vadd.f32 (!%p3367_p3), %v5029_v40, %v2150_v38 }
 0x2bc   : > { %v1987_v44 = vpop.f32.mrb[112].mxu1  ;;  %v1700_v45 = vpop.f32.mrb[113].mxu0 }
 0x2bd   : > { %v1988_v46 = vadd.f32 %v1987_v44, %v1698_v42  ;;  %v1989_v47 = vpop.f32.mrb[113].mxu1  ;;  %v1701_v48 = vpop.f32.mrb[114].mxu0  ;;  %3746 = vmatpush3.bf16.msra.mxu0 (!%p3367_p3), %v4206_v35  ;;  %3832 = vmatpush3.bf16.msra.mxu1 (!%p3367_p3), %v4206_v35  ;;  %v2222_v42 = vadd.f32 (!%p3367_p3), %v5029_v40, %v2151_v39  ;;  %v2183_v44 = vld [vmem:[#allocation2 + $0x108] sm:$0xff] (!%p3367_p3)  ;;  %v2160_v39 = vld [vmem:[#allocation2 + $0x50] sm:$0xff] (!%p3367_p3) }
 0x2be   : > { %v1990_v50 = vpop.f32.mrb[114].mxu1  ;;  %v1703_v51 = vpop.f32.mrb[115].mxu0  ;;  %3747 = vmatprep.subr.bf16.mxu0 (!%p3367_p3), %v4207_v36  ;;  %3825 = vmatprep.subr.bf16.mxu1 (!%p3367_p3), %v4207_v36  ;;  %v2285_v47 = vmax.f32 (!%p3367_p3), %v2221_v41, 0.0  ;;  %v2161_v41 = vld [vmem:[#allocation2 + $0x58] sm:$0xff] (!%p3367_p3) }
 0x2bf   : > { %v2074_v52 = vadd.f32 %v1988_v46, %v472_v43  ;;  %v1991_v53 = vadd.f32 %v1990_v50, %v1701_v48  ;;  %v1992_v54 = vpop.f32.mrb[115].mxu1  ;;  %v2182_v43 = vld [vmem:[#allocation2 + $0x100] sm:$0xff] (!%p3367_p3)  ;;  %v2254_v46 = vadd.f32 (!%p3367_p3), %v5029_v40, %v2183_v44  ;;  %v2286_v48 = vmax.f32 (!%p3367_p3), %v2222_v42, 0.0 }
 0x2c0   : > { %v2253_v45 = vadd.f32 (!%p3367_p3), %v5029_v40, %v2182_v43  ;;  %v4210_v54 = vld [vmem:[#allocation9 + $0x28] sm:$0xff] (!%p3367_p3)  }
 0x2c1   : > { %2138 = vst [vmem:[#allocation2 + $0x1c0] sm:$0xff] %v2074_v52  ;;  %v2075_v55 = vadd.f32 %v1991_v53, %v473_v49  ;;  %3748 = vmatpush3.bf16.msra.mxu0 (!%p3367_p3), %v4207_v36  ;;  %3833 = vmatpush3.bf16.msra.mxu1 (!%p3367_p3), %v4207_v36  ;;  %v4209_v49 = vld [vmem:[#allocation9 + $0x20] sm:$0xff] (!%p3367_p3)   ;;  %v2318_v51 = vmax.f32 (!%p3367_p3), %v2254_v46, 0.0  ;;  %v2349_v52 = vpack.c.bf16 (!%p3367_p3), %v2286_v48, %v2285_v47  ;;  %v2192_v46 = vld [vmem:[#allocation2 + $0x150] sm:$0xff] (!%p3367_p3)  ;;  %v2193_v47 = vld [vmem:[#allocation2 + $0x158] sm:$0xff] (!%p3367_p3) }
 0x2c2   : > { %3749 = vmatprep.subr.bf16.mxu0 (!%p3367_p3), %v4208_v37  ;;  %3826 = vmatprep.subr.bf16.mxu1 (!%p3367_p3), %v4208_v37  ;;  %v2317_v50 = vmax.f32 (!%p3367_p3), %v2253_v45, 0.0 }
 0x2c3   : > { %2139 = vst [vmem:[#allocation2 + $0x1c8] sm:$0xff] %v2075_v55  ;;  %v1706_v56 = vpop.f32.mrb[116].mxu0  ;;  %3759 = vmatprep.mubr.bf16.mxu0 (!%p3367_p3), %v2349_v52  ;;  %v2152_v55 = vld [vmem:[#allocation2 + $0x10] sm:$0xff] (!%p3367_p3)  ;;  %v2194_v52 = vld [vmem:[#allocation2 + $0x160] sm:$0xff] (!%p3367_p3) }
 0x2c4   : > { %v1995_v58 = vpop.f32.mrb[116].mxu1  ;;  %v1708_v59 = vpop.f32.mrb[117].mxu0  ;;  %v2365_v53 = vpack.c.bf16 (!%p3367_p3), %v2318_v51, %v2317_v50  ;;  %v2162_v50 = vld [vmem:[#allocation2 + $0x60] sm:$0xff] (!%p3367_p3)  ;;  %v2163_v51 = vld [vmem:[#allocation2 + $0x68] sm:$0xff] (!%p3367_p3) }
 0x2c5   : > { %v1996_v60 = vadd.f32 %v1995_v58, %v1706_v56  ;;  %v1997_v61 = vpop.f32.mrb[117].mxu1  ;;  %v1709_v62 = vpop.f32.mrb[118].mxu0  ;;  %3750 = vmatpush3.bf16.msra.mxu0 (!%p3367_p3), %v4208_v37  ;;  %3834 = vmatpush3.bf16.msra.mxu1 (!%p3367_p3), %v4208_v37  ;;  %v2153_v56 = vld [vmem:[#allocation2 + $0x18] sm:$0xff] (!%p3367_p3)  ;;  %v2154_v59 = vld [vmem:[#allocation2 + $0x20] sm:$0xff] (!%p3367_p3) }
 0x2c6   : > { %v1998_v0 = vpop.f32.mrb[118].mxu1  ;;  %v1711_v1 = vpop.f32.mrb[119].mxu0  ;;  %3751 = vmatprep.subr.bf16.mxu0 (!%p3367_p3), %v4209_v49  ;;  %3827 = vmatprep.subr.bf16.mxu1 (!%p3367_p3), %v4209_v49  ;;  %v2185_v58 = vld [vmem:[#allocation2 + $0x118] sm:$0xff] (!%p3367_p3) }
 0x2c7   : > { %v2076_v2 = vadd.f32 %v1996_v60, %v474_v57  ;;  %v1999_v3 = vadd.f32 %v1998_v0, %v1709_v62  ;;  %v2000_v4 = vpop.f32.mrb[119].mxu1  ;;  %3791 = vmatprep.mubr.bf16.mxu1 (!%p3367_p3), %v2365_v53  ;;  %v2184_v57 = vld [vmem:[#allocation2 + $0x110] sm:$0xff] (!%p3367_p3)  ;;  %v2155_v60 = vld [vmem:[#allocation2 + $0x28] sm:$0xff] (!%p3367_p3)  ;;  %v2223_v62 = vadd.f32 (!%p3367_p3), %v5029_v40, %v2152_v55  ;;  %v2186_v0 = vld [vmem:[#allocation2 + $0x120] sm:$0xff] (!%p3367_p3)  ;;  %v2232_v55 = vadd.f32 (!%p3367_p3), %v5029_v40, %v2161_v41 }
 0x2c8   : > { %v4211_v61 = vld [vmem:[#allocation9 + $0x30] sm:$0xff] (!%p3367_p3)   ;;  %v2187_v1 = vld [vmem:[#allocation2 + $0x128] sm:$0xff] (!%p3367_p3)  ;;  %v2225_v4 = vadd.f32 (!%p3367_p3), %v5029_v40, %v2154_v59 }
 0x2c9   : > { %2140 = vst [vmem:[#allocation2 + $0x1d0] sm:$0xff] %v2076_v2  ;;  %v2077_v5 = vadd.f32 %v1999_v3, %v475_v63  ;;  %3752 = vmatpush3.bf16.msra.mxu0 (!%p3367_p3), %v4209_v49  ;;  %3835 = vmatpush3.bf16.msra.mxu1 (!%p3367_p3), %v4209_v49  ;;  %v2224_v63 = vadd.f32 (!%p3367_p3), %v5029_v40, %v2153_v56  ;;  %v2195_v53 = vld [vmem:[#allocation2 + $0x168] sm:$0xff] (!%p3367_p3) }
 0x2ca   : > { %3753 = vmatprep.subr.bf16.mxu0 (!%p3367_p3), %v4210_v54  ;;  %3828 = vmatprep.subr.bf16.mxu1 (!%p3367_p3), %v4210_v54  ;;  %v2255_v2 = vadd.f32 (!%p3367_p3), %v5029_v40, %v2184_v57  ;;  %v2256_v3 = vadd.f32 (!%p3367_p3), %v5029_v40, %v2185_v58  ;;  %v2263_v56 = vadd.f32 (!%p3367_p3), %v5029_v40, %v2192_v46  ;;  %v2203_v46 = vld [vmem:[#allocation2 + $0x1a8] sm:$0xff] (!%p3367_p3) }
 0x2cb   : > { %2141 = vst [vmem:[#allocation2 + $0x1d8] sm:$0xff] %v2077_v5  ;;  %v1714_v6 = vpop.f32.mrb[120].mxu0  ;;  %v2226_v5 = vadd.f32 (!%p3367_p3), %v5029_v40, %v2155_v60  ;;  %v2264_v57 = vadd.f32 (!%p3367_p3), %v5029_v40, %v2193_v47 }
 0x2cc   : > { %v2003_v8 = vpop.f32.mrb[120].mxu1  ;;  %v1716_v9 = vpop.f32.mrb[121].mxu0 }
 0x2cd   : > { %v2004_v10 = vadd.f32 %v2003_v8, %v1714_v6  ;;  %v2005_v11 = vpop.f32.mrb[121].mxu1  ;;  %v1717_v12 = vpop.f32.mrb[122].mxu0  ;;  %3754 = vmatpush3.bf16.msra.mxu0 (!%p3367_p3), %v4210_v54  ;;  %3836 = vmatpush3.bf16.msra.mxu1 (!%p3367_p3), %v4210_v54  ;;  %v2257_v6 = vadd.f32 (!%p3367_p3), %v5029_v40, %v2186_v0  ;;  %v4212_v8 = vld [vmem:[#allocation9 + $0x38] sm:$0xff] (!%p3367_p3)   ;;  %v2287_v9 = vmax.f32 (!%p3367_p3), %v2223_v62, 0.0  ;;  %v2231_v54 = vadd.f32 (!%p3367_p3), %v5029_v40, %v2160_v39 }
 0x2ce   : > { %v2006_v14 = vpop.f32.mrb[122].mxu1  ;;  %v1719_v15 = vpop.f32.mrb[123].mxu0  ;;  %3755 = vmatprep.subr.bf16.mxu0 (!%p3367_p3), %v4211_v61  ;;  %3829 = vmatprep.subr.bf16.mxu1 (!%p3367_p3), %v4211_v61  ;;  %v2319_v11 = vmax.f32 (!%p3367_p3), %v2255_v2, 0.0  ;;  %v2265_v0 = vadd.f32 (!%p3367_p3), %v5029_v40, %v2194_v52  ;;  %v2201_v39 = vld [vmem:[#allocation2 + $0x198] sm:$0xff] (!%p3367_p3) }
 0x2cf   : > { %v2078_v16 = vadd.f32 %v2004_v10, %v476_v7  ;;  %v2007_v17 = vadd.f32 %v2006_v14, %v1717_v12  ;;  %v2008_v18 = vpop.f32.mrb[123].mxu1  ;;  %v2258_v7 = vadd.f32 (!%p3367_p3), %v5029_v40, %v2187_v1  ;;  %v2288_v10 = vmax.f32 (!%p3367_p3), %v2224_v63, 0.0  ;;  %v2156_v15 = vld [vmem:[#allocation2 + $0x30] sm:$0xff] (!%p3367_p3) }
 0x2d0   : > { %v2320_v12 = vmax.f32 (!%p3367_p3), %v2256_v3, 0.0  ;;  %v2290_v14 = vmax.f32 (!%p3367_p3), %v2226_v5, 0.0  ;;  %v2321_v18 = vmax.f32 (!%p3367_p3), %v2257_v6, 0.0  ;;  %v2234_v63 = vadd.f32 (!%p3367_p3), %v5029_v40, %v2163_v51  ;;  %v2164_v6 = vld [vmem:[#allocation2 + $0x70] sm:$0xff] (!%p3367_p3) }
 0x2d1   : > { %2142 = vst [vmem:[#allocation2 + $0x1e0] sm:$0xff] %v2078_v16  ;;  %v2079_v19 = vadd.f32 %v2007_v17, %v477_v13  ;;  %v2289_v13 = vmax.f32 (!%p3367_p3), %v2225_v4, 0.0  ;;  %v2157_v16 = vld [vmem:[#allocation2 + $0x38] sm:$0xff] (!%p3367_p3)  ;;  %v2188_v17 = vld [vmem:[#allocation2 + $0x130] sm:$0xff] (!%p3367_p3)  ;;  %3756 = vmatpush3.bf16.msra.mxu0 (!%p3367_p3), %v4211_v61  ;;  %3837 = vmatpush3.bf16.msra.mxu1 (!%p3367_p3), %v4211_v61  ;;  %v2233_v61 = vadd.f32 (!%p3367_p3), %v5029_v40, %v2162_v50  ;;  %v2295_v2 = vmax.f32 (!%p3367_p3), %v2231_v54, 0.0 }
 0x2d2   : > { %3757 = vmatprep.subr.bf16.mxu0 (!%p3367_p3), %v4212_v8  ;;  %3830 = vmatprep.subr.bf16.mxu1 (!%p3367_p3), %v4212_v8  ;;  %v2266_v1 = vadd.f32 (!%p3367_p3), %v5029_v40, %v2195_v53  ;;  %v2296_v3 = vmax.f32 (!%p3367_p3), %v2232_v55, 0.0  ;;  %v2327_v4 = vmax.f32 (!%p3367_p3), %v2263_v56, 0.0  ;;  %v2328_v5 = vmax.f32 (!%p3367_p3), %v2264_v57, 0.0 }
 0x2d3   : > { %2143 = vst [vmem:[#allocation2 + $0x1e8] sm:$0xff] %v2079_v19  ;;  %v1722_v20 = vpop.f32.mrb[124].mxu0  ;;  %v2322_v19 = vmax.f32 (!%p3367_p3), %v2258_v7, 0.0  ;;  %v2165_v7 = vld [vmem:[#allocation2 + $0x78] sm:$0xff] (!%p3367_p3)  ;;  %v2272_v50 = vadd.f32 (!%p3367_p3), %v5029_v40, %v2201_v39 }
 0x2d4   : > { %v2011_v22 = vpop.f32.mrb[124].mxu1  ;;  %v1724_v23 = vpop.f32.mrb[125].mxu0 }
 0x2d5   : > { %v2012_v24 = vadd.f32 %v2011_v22, %v1722_v20  ;;  %v2013_v25 = vpop.f32.mrb[125].mxu1  ;;  %v1725_v26 = vpop.f32.mrb[126].mxu0  ;;  %2149 = sbr.rel (%p3367_p3) target bundleno = 1004 (0x3ec), region = 60  ;;  %v2189_v20 = vld [vmem:[#allocation2 + $0x138] sm:$0xff] (!%p3367_p3)  ;;  %v2159_v22 = vld [vmem:[#allocation2 + $0x48] sm:$0xff] (!%p3367_p3)  ;;  %v2350_v23 = vpack.c.bf16 (!%p3367_p3), %v2288_v10, %v2287_v9  ;;  %3758 = vmatpush3.bf16.msra.mxu0 (!%p3367_p3), %v4212_v8  ;;  %3838 = vmatpush3.bf16.msra.mxu1 (!%p3367_p3), %v4212_v8  ;;  %v2367_v34 = vpack.c.bf16 (!%p3367_p3), %v2322_v19, %v2321_v18  ;;  %v2196_v8 = vld [vmem:[#allocation2 + $0x170] sm:$0xff] (!%p3367_p3) }
 0x2d6   : > { %v2014_v28 = vpop.f32.mrb[126].mxu1  ;;  %v1727_v29 = vpop.f32.mrb[127].mxu0  ;;  %v2191_v25 = vld [vmem:[#allocation2 + $0x148] sm:$0xff] (!%p3367_p3)  ;;  %v2197_v9 = vld [vmem:[#allocation2 + $0x178] sm:$0xff] (!%p3367_p3)  ;;  %v2297_v10 = vmax.f32 (!%p3367_p3), %v2233_v61, 0.0  ;;  %v2354_v18 = vpack.c.bf16 (!%p3367_p3), %v2296_v3, %v2295_v2  ;;  %v2370_v19 = vpack.c.bf16 (!%p3367_p3), %v2328_v5, %v2327_v4 }
 0x2d7   : > { %v2080_v30 = vadd.f32 %v2012_v24, %v478_v21  ;;  %v2015_v31 = vadd.f32 %v2014_v28, %v1725_v26  ;;  %v2016_v32 = vpop.f32.mrb[127].mxu1  ;;  %v2158_v21 = vld [vmem:[#allocation2 + $0x40] sm:$0xff] (!%p3367_p3)  ;;  %v2366_v26 = vpack.c.bf16 (!%p3367_p3), %v2320_v12, %v2319_v11  ;;  %v2228_v28 = vadd.f32 (!%p3367_p3), %v5029_v40, %v2157_v16  ;;  %v2205_v2 = vld [vmem:[#allocation2 + $0x1b8] sm:$0xff] (!%p3367_p3) }
 0x2d8   : > { %v2190_v24 = vld [vmem:[#allocation2 + $0x140] sm:$0xff] (!%p3367_p3)  ;;  %v2259_v29 = vadd.f32 (!%p3367_p3), %v5029_v40, %v2188_v17  ;;  %v2229_v32 = vadd.f32 (!%p3367_p3), %v5029_v40, %v2158_v21  ;;  %v2262_v36 = vadd.f32 (!%p3367_p3), %v5029_v40, %v2191_v25  ;;  %3760 = vmatmul.mubr.bf16.vlgmr.msra.gmra.mrb[0].mxu0 (!%p3367_p3), %v2350_v23  ;;  %v2298_v11 = vmax.f32 (!%p3367_p3), %v2234_v63, 0.0  ;;  %v2199_v17 = vld [vmem:[#allocation2 + $0x188] sm:$0xff] (!%p3367_p3)  ;;  %v2172_v63 = vld [vmem:[#allocation2 + $0xb0] sm:$0xff] (!%p3367_p3) }
 0x2d9   : > { %2144 = vst [vmem:[#allocation2 + $0x1f0] sm:$0xff] %v2080_v30  ;;  %v2081_v33 = vadd.f32 %v2015_v31, %v479_v27  ;;  %v2227_v27 = vadd.f32 (!%p3367_p3), %v5029_v40, %v2156_v15  ;;  %v2351_v30 = vpack.c.bf16 (!%p3367_p3), %v2290_v14, %v2289_v13  ;;  %v2260_v31 = vadd.f32 (!%p3367_p3), %v5029_v40, %v2189_v20  ;;  %v2166_v14 = vld [vmem:[#allocation2 + $0x80] sm:$0xff] (!%p3367_p3)  ;;  %v2167_v15 = vld [vmem:[#allocation2 + $0x88] sm:$0xff] (!%p3367_p3) }
 0x2da   : > { %v2261_v35 = vadd.f32 (!%p3367_p3), %v5029_v40, %v2190_v24  ;;  %v2292_v38 = vmax.f32 (!%p3367_p3), %v2228_v28, 0.0  ;;  %3792 = vmatmul.mubr.bf16.vlgmr.msra.gmra.mrb[0].mxu1 (!%p3367_p3), %v2366_v26  ;;  %v2323_v42 = vmax.f32 (!%p3367_p3), %v2259_v29, 0.0  ;;  %v2293_v44 = vmax.f32 (!%p3367_p3), %v2229_v32, 0.0  ;;  %v2198_v16 = vld [vmem:[#allocation2 + $0x180] sm:$0xff] (!%p3367_p3)  ;;  %v2168_v32 = vld [vmem:[#allocation2 + $0x90] sm:$0xff] (!%p3367_p3) }
 0x2db   : > { %2145 = vst [vmem:[#allocation2 + $0x1f8] sm:$0xff] %v2081_v33  ;;  %v2230_v33 = vadd.f32 (!%p3367_p3), %v5029_v40, %v2159_v22  ;;  %v2291_v37 = vmax.f32 (!%p3367_p3), %v2227_v27, 0.0  ;;  %v2324_v43 = vmax.f32 (!%p3367_p3), %v2260_v31, 0.0  ;;  %3763 = vmatprep.mubr.bf16.mxu0 (!%p3367_p3), %v2351_v30  ;;  %3795 = vmatprep.mubr.bf16.mxu1 (!%p3367_p3), %v2367_v34  ;;  %v2326_v49 = vmax.f32 (!%p3367_p3), %v2262_v36, 0.0 }
 0x2dc   : > { %v2325_v48 = vmax.f32 %v2261_v35, 0.0  ;;  %v2329_v12 = vmax.f32 %v2265_v0, 0.0  ;;  %v2330_v13 = vmax.f32 %v2266_v1, 0.0  ;;  %v2235_v20 = vadd.f32 %v5029_v40, %v2164_v6  ;;  %v2173_v0 = vld [vmem:[#allocation2 + $0xb8] sm:$0xff]  ;;  %v2204_v1 = vld [vmem:[#allocation2 + $0x1b0] sm:$0xff] }
 0x2dd   : > { %v2294_v45 = vmax.f32 %v2230_v33, 0.0  ;;  %v2352_v58 = vpack.c.bf16 %v2292_v38, %v2291_v37  ;;  %v2368_v59 = vpack.c.bf16 %v2324_v43, %v2323_v42  ;;  %v2236_v21 = vadd.f32 %v5029_v40, %v2165_v7  ;;  %v2169_v33 = vld [vmem:[#allocation2 + $0x98] sm:$0xff]  ;;  %v2200_v38 = vld [vmem:[#allocation2 + $0x190] sm:$0xff]  ;;  %v2170_v43 = vld [vmem:[#allocation2 + $0xa0] sm:$0xff] }
 0x2de   : > { %v2369_v62 = vpack.c.bf16 %v2326_v49, %v2325_v48  ;;  %v2267_v22 = vadd.f32 %v5029_v40, %v2196_v8  ;;  %v2268_v23 = vadd.f32 %v5029_v40, %v2197_v9  ;;  %v2237_v24 = vadd.f32 %v5029_v40, %v2166_v14  ;;  %v2174_v7 = vld [vmem:[#allocation2 + $0xc0] sm:$0xff]  ;;  %v2175_v8 = vld [vmem:[#allocation2 + $0xc8] sm:$0xff] }
 0x2df   : > { %v2353_v60 = vpack.c.bf16 %v2294_v45, %v2293_v44  ;;  %v2238_v25 = vadd.f32 %v5029_v40, %v2167_v15  ;;  %v2355_v26 = vpack.c.bf16 %v2298_v11, %v2297_v10  ;;  %v2371_v27 = vpack.c.bf16 %v2330_v13, %v2329_v12  ;;  %v2171_v44 = vld [vmem:[#allocation2 + $0xa8] sm:$0xff]  ;;  %v2202_v45 = vld [vmem:[#allocation2 + $0x1a0] sm:$0xff] }
 0x2e0   : > { %3764 = vmatmul.mubr.bf16.gmra.mrb[4].mxu0 %v2352_v58  ;;  %v2269_v28 = vadd.f32 %v5029_v40, %v2198_v16  ;;  %v2270_v29 = vadd.f32 %v5029_v40, %v2199_v17  ;;  %v2299_v30 = vmax.f32 %v2235_v20, 0.0  ;;  %v2300_v31 = vmax.f32 %v2236_v21, 0.0  ;;  %v2206_v9 = vld [vmem:[#allocation2 + $0x1c0] sm:$0xff]  ;;  %v2207_v10 = vld [vmem:[#allocation2 + $0x1c8] sm:$0xff] }
 0x2e1   : > { %3767 = vmatprep.mubr.bf16.mxu0 %v2353_v60  ;;  %v2331_v34 = vmax.f32 %v2267_v22, 0.0  ;;  %v2332_v35 = vmax.f32 %v2268_v23, 0.0  ;;  %v2301_v36 = vmax.f32 %v2237_v24, 0.0  ;;  %v2302_v37 = vmax.f32 %v2238_v25, 0.0  ;;  %v2176_v25 = vld [vmem:[#allocation2 + $0xd0] sm:$0xff] }
 0x2e2   : > { %3796 = vmatmul.mubr.bf16.gmra.mrb[4].mxu1 %v2368_v59  ;;  %v2333_v41 = vmax.f32 %v2269_v28, 0.0  ;;  %v2334_v42 = vmax.f32 %v2270_v29, 0.0  ;;  %v2239_v47 = vadd.f32 %v5029_v40, %v2168_v32  ;;  %v2240_v48 = vadd.f32 %v5029_v40, %v2169_v33  ;;  %v2209_v32 = vld [vmem:[#allocation2 + $0x1d8] sm:$0xff] }
 0x2e3   : > { %3799 = vmatprep.mubr.bf16.mxu1 %v2369_v62  ;;  %v2271_v49 = vadd.f32 %v5029_v40, %v2200_v38  ;;  %v2356_v51 = vpack.c.bf16 %v2300_v31, %v2299_v30  ;;  %v2372_v52 = vpack.c.bf16 %v2332_v35, %v2331_v34  ;;  %v2357_v53 = vpack.c.bf16 %v2302_v37, %v2301_v36  ;;  %v2208_v31 = vld [vmem:[#allocation2 + $0x1d0] sm:$0xff]  ;;  %v2178_v35 = vld [vmem:[#allocation2 + $0xe0] sm:$0xff]  ;;  %v2179_v36 = vld [vmem:[#allocation2 + $0xe8] sm:$0xff] }
 0x2e4   : > { %v2241_v54 = vadd.f32 %v5029_v40, %v2170_v43  ;;  %v2373_v55 = vpack.c.bf16 %v2334_v42, %v2333_v41  ;;  %v2242_v56 = vadd.f32 %v5029_v40, %v2171_v44  ;;  %v2273_v57 = vadd.f32 %v5029_v40, %v2202_v45  ;;  %v2210_v37 = vld [vmem:[#allocation2 + $0x1e0] sm:$0xff]  ;;  %v2211_v38 = vld [vmem:[#allocation2 + $0x1e8] sm:$0xff] }
 0x2e5   : > { %v2274_v58 = vadd.f32 %v5029_v40, %v2203_v46  ;;  %v2303_v59 = vmax.f32 %v2239_v47, 0.0  ;;  %v2304_v60 = vmax.f32 %v2240_v48, 0.0  ;;  %v2335_v61 = vmax.f32 %v2271_v49, 0.0 }
 0x2e6   : > { %v2336_v62 = vmax.f32 %v2272_v50, 0.0  ;;  %v2305_v3 = vmax.f32 %v2241_v54, 0.0  ;;  %v2306_v4 = vmax.f32 %v2242_v56, 0.0  ;;  %v2337_v5 = vmax.f32 %v2273_v57, 0.0  ;;  %v2180_v56 = vld [vmem:[#allocation2 + $0xf0] sm:$0xff]  ;;  %v2181_v57 = vld [vmem:[#allocation2 + $0xf8] sm:$0xff] }
 0x2e7   : > { %v2338_v6 = vmax.f32 %v2274_v58, 0.0  ;;  %v2358_v11 = vpack.c.bf16 %v2304_v60, %v2303_v59  ;;  %v2243_v13 = vadd.f32 %v5029_v40, %v2172_v63  ;;  %v2244_v14 = vadd.f32 %v5029_v40, %v2173_v0  ;;  %v2213_v63 = vld [vmem:[#allocation2 + $0x1f8] sm:$0xff] }
 0x2e8   : > { %3768 = vmatmul.mubr.bf16.gmra.mrb[8].mxu0 %v2354_v18  ;;  %v2374_v12 = vpack.c.bf16 %v2336_v62, %v2335_v61  ;;  %v2275_v15 = vadd.f32 %v5029_v40, %v2204_v1  ;;  %v2276_v16 = vadd.f32 %v5029_v40, %v2205_v2  ;;  %v2245_v17 = vadd.f32 %v5029_v40, %v2174_v7  ;;  %v2212_v62 = vld [vmem:[#allocation2 + $0x1f0] sm:$0xff] }
 0x2e9   : > { %3771 = vmatprep.mubr.bf16.mxu0 %v2355_v26  ;;  %v2246_v18 = vadd.f32 %v5029_v40, %v2175_v8  ;;  %v2375_v20 = vpack.c.bf16 %v2338_v6, %v2337_v5  ;;  %v2277_v21 = vadd.f32 %v5029_v40, %v2206_v9  ;;  %v2278_v22 = vadd.f32 %v5029_v40, %v2207_v10  ;;  %v2177_v26 = vld [vmem:[#allocation2 + $0xd8] sm:$0xff] }
 0x2ea   : > { %3800 = vmatmul.mubr.bf16.gmra.mrb[8].mxu1 %v2370_v19  ;;  %v2359_v19 = vpack.c.bf16 %v2306_v4, %v2305_v3  ;;  %v2307_v23 = vmax.f32 %v2243_v13, 0.0  ;;  %v2308_v24 = vmax.f32 %v2244_v14, 0.0  ;;  %v2340_v28 = vmax.f32 %v2276_v16, 0.0 }
 0x2eb   : > { %3803 = vmatprep.mubr.bf16.mxu1 %v2371_v27  ;;  %v2339_v27 = vmax.f32 %v2275_v15, 0.0  ;;  %v2309_v29 = vmax.f32 %v2245_v17, 0.0  ;;  %v2310_v30 = vmax.f32 %v2246_v18, 0.0  ;;  %v2341_v33 = vmax.f32 %v2277_v21, 0.0 }
 0x2ec   : > { %v2342_v34 = vmax.f32 %v2278_v22, 0.0  ;;  %v2247_v39 = vadd.f32 %v5029_v40, %v2176_v25  ;;  %v2248_v41 = vadd.f32 %v5029_v40, %v2177_v26  ;;  %v2279_v42 = vadd.f32 %v5029_v40, %v2208_v31 }
 0x2ed   : > { %v2280_v43 = vadd.f32 %v5029_v40, %v2209_v32  ;;  %v2360_v44 = vpack.c.bf16 %v2308_v24, %v2307_v23  ;;  %v2376_v45 = vpack.c.bf16 %v2340_v28, %v2339_v27  ;;  %v2361_v46 = vpack.c.bf16 %v2310_v30, %v2309_v29 }
 0x2ee   : > { %v2249_v47 = vadd.f32 %v5029_v40, %v2178_v35  ;;  %v2377_v48 = vpack.c.bf16 %v2342_v34, %v2341_v33  ;;  %v2250_v49 = vadd.f32 %v5029_v40, %v2179_v36  ;;  %v2281_v50 = vadd.f32 %v5029_v40, %v2210_v37 }
 0x2ef   : > { %v2343_v54 = vmax.f32 %v2279_v42, 0.0  ;;  %v2251_v2 = vadd.f32 %v5029_v40, %v2180_v56  ;;  %v2252_v3 = vadd.f32 %v5029_v40, %v2181_v57  ;;  %v2283_v4 = vadd.f32 %v5029_v40, %v2212_v62 }
 0x2f0   : > { %3772 = vmatmul.mubr.bf16.gmra.mrb[12].mxu0 %v2356_v51  ;;  %v2282_v51 = vadd.f32 %v5029_v40, %v2211_v38  ;;  %v2313_v58 = vmax.f32 %v2249_v47, 0.0  ;;  %v2314_v59 = vmax.f32 %v2250_v49, 0.0  ;;  %v2345_v60 = vmax.f32 %v2281_v50, 0.0 }
 0x2f1   : > { %3775 = vmatprep.mubr.bf16.mxu0 %v2357_v53  ;;  %v2312_v53 = vmax.f32 %v2248_v41, 0.0  ;;  %v2284_v5 = vadd.f32 %v5029_v40, %v2213_v63  ;;  %v2315_v8 = vmax.f32 %v2251_v2, 0.0  ;;  %v2316_v9 = vmax.f32 %v2252_v3, 0.0 }
 0x2f2   : > { %3804 = vmatmul.mubr.bf16.gmra.mrb[12].mxu1 %v2372_v52  ;;  %v2311_v52 = vmax.f32 %v2247_v39, 0.0  ;;  %v2346_v61 = vmax.f32 %v2282_v51, 0.0  ;;  %v2363_v6 = vpack.c.bf16 %v2314_v59, %v2313_v58  ;;  %v2347_v10 = vmax.f32 %v2283_v4, 0.0 }
 0x2f3   : > { %3807 = vmatprep.mubr.bf16.mxu1 %v2373_v55  ;;  %v2344_v55 = vmax.f32 %v2280_v43, 0.0 }
 0x2f4   : > { %v2362_v0 = vpack.c.bf16 %v2312_v53, %v2311_v52  ;;  %v2379_v7 = vpack.c.bf16 %v2346_v61, %v2345_v60 }
 0x2f5   : > { %v2378_v1 = vpack.c.bf16 %v2344_v55, %v2343_v54 }
 0x2f8   : > { %3776 = vmatmul.mubr.bf16.gmra.mrb[16].mxu0 %v2358_v11  ;;  %v2348_v11 = vmax.f32 %v2284_v5, 0.0 }
 0x2f9   : > { %3779 = vmatprep.mubr.bf16.mxu0 %v2359_v19 }
 0x2fa   : > { %3808 = vmatmul.mubr.bf16.gmra.mrb[16].mxu1 %v2374_v12  ;;  %v2364_v12 = vpack.c.bf16 %v2316_v9, %v2315_v8  ;;  %v2380_v13 = vpack.c.bf16 %v2348_v11, %v2347_v10 }
 0x2fb   : > { %3811 = vmatprep.mubr.bf16.mxu1 %v2375_v20 }
 0x300   : > { %3780 = vmatmul.mubr.bf16.gmra.mrb[20].mxu0 %v2360_v44 }
 0x301   : > { %3783 = vmatprep.mubr.bf16.mxu0 %v2361_v46 }
 0x302   : > { %3812 = vmatmul.mubr.bf16.gmra.mrb[20].mxu1 %v2376_v45 }
 0x303   : > { %3815 = vmatprep.mubr.bf16.mxu1 %v2377_v48 }
 0x308   : > { %3784 = vmatmul.mubr.bf16.gmra.mrb[24].mxu0 %v2362_v0 }
 0x309   : > { %3787 = vmatprep.mubr.bf16.mxu0 %v2363_v6 }
 0x30a   : > { %3816 = vmatmul.mubr.bf16.gmra.mrb[24].mxu1 %v2378_v1 }
 0x30b   : > { %3819 = vmatprep.mubr.bf16.mxu1 %v2379_v7 }
 0x310   : > { %3788 = vmatmul.mubr.bf16.gmra.mrb[28].mxu0 %v2364_v12 }
 0x312   : > { %3820 = vmatmul.mubr.bf16.gmra.mrb[28].mxu1 %v2380_v13 }
 0x3ab   : > { %v3761_v14 = vpop.f32.mrb[0].mxu0 }
 0x3ac   : > { %v2479_v15 = vpop.f32.mrb[1].mxu0 }
 0x3ad   : > { %v3793_v40 = vpop.f32.mrb[0].mxu1  ;;  %v3762_v17 = vpop.f32.mrb[2].mxu0 }
 0x3ae   : > { %v2607_v16 = vpop.f32.mrb[1].mxu1  ;;  %v3520_v19 = vpack.c.bf16 %v3762_v17, %v3761_v14  ;;  %v2482_v21 = vpop.f32.mrb[3].mxu0 }
 0x3af   : > { %v3794_v18 = vpop.f32.mrb[2].mxu1  ;;  %v3515_v23 = vpack.c.bf16 %v2482_v21, %v2479_v15 }
 0x3b0   : > { %v3600_v20 = vpack.c.bf16 %v3794_v18, %v3793_v40  ;;  %v2610_v22 = vpop.f32.mrb[3].mxu1  ;;  %3672 = vst [vmem:[%s4766_s9 + $0x8] sm:$0xff] %v3520_v19  }
 0x3b1   : > { %v3595_v24 = vpack.c.bf16 %v2610_v22, %v2607_v16  ;;  %3516 = vst [vmem:[%s4766_s9] sm:$0xff] %v3515_v23  }
 0x3b2   : > { %3688 = vst [vmem:[%s4766_s9 + $0x88] sm:$0xff] %v3600_v20  }
 0x3b3   : > { %3687 = vst [vmem:[%s4766_s9 + $0x80] sm:$0xff] %v3595_v24   ;;  %v3765_v25 = vpop.f32.mrb[4].mxu0 }
 0x3b4   : > { %v2495_v27 = vpop.f32.mrb[5].mxu0 }
 0x3b5   : > { %v3797_v26 = vpop.f32.mrb[4].mxu1  ;;  %v3766_v29 = vpop.f32.mrb[6].mxu0 }
 0x3b6   : > { %v2623_v28 = vpop.f32.mrb[5].mxu1  ;;  %v3530_v31 = vpack.c.bf16 %v3766_v29, %v3765_v25  ;;  %v2498_v33 = vpop.f32.mrb[7].mxu0 }
 0x3b7   : > { %v3798_v30 = vpop.f32.mrb[6].mxu1  ;;  %v3525_v35 = vpack.c.bf16 %v2498_v33, %v2495_v27 }
 0x3b8   : > { %v3610_v32 = vpack.c.bf16 %v3798_v30, %v3797_v26  ;;  %v2626_v34 = vpop.f32.mrb[7].mxu1  ;;  %3674 = vst [vmem:[%s4766_s9 + $0x18] sm:$0xff] %v3530_v31  }
 0x3b9   : > { %v3605_v36 = vpack.c.bf16 %v2626_v34, %v2623_v28  ;;  %3673 = vst [vmem:[%s4766_s9 + $0x10] sm:$0xff] %v3525_v35  }
 0x3ba   : > { %3690 = vst [vmem:[%s4766_s9 + $0x98] sm:$0xff] %v3610_v32  }
 0x3bb   : > { %3689 = vst [vmem:[%s4766_s9 + $0x90] sm:$0xff] %v3605_v36   ;;  %v3769_v37 = vpop.f32.mrb[8].mxu0 }
 0x3bc   : > { %v2511_v39 = vpop.f32.mrb[9].mxu0 }
 0x3bd   : > { %v3801_v38 = vpop.f32.mrb[8].mxu1  ;;  %v3770_v42 = vpop.f32.mrb[10].mxu0 }
 0x3be   : > { %v2639_v41 = vpop.f32.mrb[9].mxu1  ;;  %v3540_v44 = vpack.c.bf16 %v3770_v42, %v3769_v37  ;;  %v2514_v46 = vpop.f32.mrb[11].mxu0 }
 0x3bf   : > { %v3802_v43 = vpop.f32.mrb[10].mxu1  ;;  %v3535_v48 = vpack.c.bf16 %v2514_v46, %v2511_v39 }
 0x3c0   : > { %v3620_v45 = vpack.c.bf16 %v3802_v43, %v3801_v38  ;;  %v2642_v47 = vpop.f32.mrb[11].mxu1  ;;  %3676 = vst [vmem:[%s4766_s9 + $0x28] sm:$0xff] %v3540_v44  }
 0x3c1   : > { %v3615_v49 = vpack.c.bf16 %v2642_v47, %v2639_v41  ;;  %3675 = vst [vmem:[%s4766_s9 + $0x20] sm:$0xff] %v3535_v48  }
 0x3c2   : > { %3692 = vst [vmem:[%s4766_s9 + $0xa8] sm:$0xff] %v3620_v45  }
 0x3c3   : > { %3691 = vst [vmem:[%s4766_s9 + $0xa0] sm:$0xff] %v3615_v49   ;;  %v3773_v50 = vpop.f32.mrb[12].mxu0 }
 0x3c4   : > { %v2527_v52 = vpop.f32.mrb[13].mxu0 }
 0x3c5   : > { %v3805_v51 = vpop.f32.mrb[12].mxu1  ;;  %v3774_v54 = vpop.f32.mrb[14].mxu0 }
 0x3c6   : > { %v2655_v53 = vpop.f32.mrb[13].mxu1  ;;  %v3550_v56 = vpack.c.bf16 %v3774_v54, %v3773_v50  ;;  %v2530_v58 = vpop.f32.mrb[15].mxu0 }
 0x3c7   : > { %v3806_v55 = vpop.f32.mrb[14].mxu1  ;;  %v3545_v60 = vpack.c.bf16 %v2530_v58, %v2527_v52 }
 0x3c8   : > { %v3630_v57 = vpack.c.bf16 %v3806_v55, %v3805_v51  ;;  %v2658_v59 = vpop.f32.mrb[15].mxu1  ;;  %3678 = vst [vmem:[%s4766_s9 + $0x38] sm:$0xff] %v3550_v56  }
 0x3c9   : > { %v3625_v61 = vpack.c.bf16 %v2658_v59, %v2655_v53  ;;  %3677 = vst [vmem:[%s4766_s9 + $0x30] sm:$0xff] %v3545_v60  }
 0x3ca   : > { %3694 = vst [vmem:[%s4766_s9 + $0xb8] sm:$0xff] %v3630_v57  }
 0x3cb   : > { %3693 = vst [vmem:[%s4766_s9 + $0xb0] sm:$0xff] %v3625_v61   ;;  %v3777_v62 = vpop.f32.mrb[16].mxu0 }
 0x3cc   : > { %v2543_v0 = vpop.f32.mrb[17].mxu0 }
 0x3cd   : > { %v3809_v63 = vpop.f32.mrb[16].mxu1  ;;  %v3778_v2 = vpop.f32.mrb[18].mxu0 }
 0x3ce   : > { %v2671_v1 = vpop.f32.mrb[17].mxu1  ;;  %v3560_v4 = vpack.c.bf16 %v3778_v2, %v3777_v62  ;;  %v2546_v6 = vpop.f32.mrb[19].mxu0 }
 0x3cf   : > { %v3810_v3 = vpop.f32.mrb[18].mxu1  ;;  %v3555_v8 = vpack.c.bf16 %v2546_v6, %v2543_v0 }
 0x3d0   : > { %v3640_v5 = vpack.c.bf16 %v3810_v3, %v3809_v63  ;;  %v2674_v7 = vpop.f32.mrb[19].mxu1  ;;  %3680 = vst [vmem:[%s4766_s9 + $0x48] sm:$0xff] %v3560_v4  }
 0x3d1   : > { %v3635_v9 = vpack.c.bf16 %v2674_v7, %v2671_v1  ;;  %3679 = vst [vmem:[%s4766_s9 + $0x40] sm:$0xff] %v3555_v8  }
 0x3d2   : > { %3696 = vst [vmem:[%s4766_s9 + $0xc8] sm:$0xff] %v3640_v5  }
 0x3d3   : > { %3695 = vst [vmem:[%s4766_s9 + $0xc0] sm:$0xff] %v3635_v9   ;;  %v3781_v10 = vpop.f32.mrb[20].mxu0 }
 0x3d4   : > { %v2559_v12 = vpop.f32.mrb[21].mxu0 }
 0x3d5   : > { %v3813_v11 = vpop.f32.mrb[20].mxu1  ;;  %v3782_v14 = vpop.f32.mrb[22].mxu0 }
 0x3d6   : > { %v2687_v13 = vpop.f32.mrb[21].mxu1  ;;  %v3570_v15 = vpack.c.bf16 %v3782_v14, %v3781_v10  ;;  %v2562_v17 = vpop.f32.mrb[23].mxu0 }
 0x3d7   : > { %v3814_v40 = vpop.f32.mrb[22].mxu1  ;;  %v3565_v19 = vpack.c.bf16 %v2562_v17, %v2559_v12 }
 0x3d8   : > { %v3650_v16 = vpack.c.bf16 %v3814_v40, %v3813_v11  ;;  %v2690_v18 = vpop.f32.mrb[23].mxu1  ;;  %3682 = vst [vmem:[%s4766_s9 + $0x58] sm:$0xff] %v3570_v15  }
 0x3d9   : > { %v3645_v20 = vpack.c.bf16 %v2690_v18, %v2687_v13  ;;  %3681 = vst [vmem:[%s4766_s9 + $0x50] sm:$0xff] %v3565_v19  }
 0x3da   : > { %3698 = vst [vmem:[%s4766_s9 + $0xd8] sm:$0xff] %v3650_v16  }
 0x3db   : > { %3697 = vst [vmem:[%s4766_s9 + $0xd0] sm:$0xff] %v3645_v20   ;;  %v3785_v21 = vpop.f32.mrb[24].mxu0 }
 0x3dc   : > { %v2575_v23 = vpop.f32.mrb[25].mxu0 }
 0x3dd   : > { %v3817_v22 = vpop.f32.mrb[24].mxu1  ;;  %v3786_v25 = vpop.f32.mrb[26].mxu0 }
 0x3de   : > { %v2703_v24 = vpop.f32.mrb[25].mxu1  ;;  %v3580_v27 = vpack.c.bf16 %v3786_v25, %v3785_v21  ;;  %v2578_v29 = vpop.f32.mrb[27].mxu0 }
 0x3df   : > { %v3818_v26 = vpop.f32.mrb[26].mxu1  ;;  %v3575_v31 = vpack.c.bf16 %v2578_v29, %v2575_v23 }
 0x3e0   : > { %v3660_v28 = vpack.c.bf16 %v3818_v26, %v3817_v22  ;;  %v2706_v30 = vpop.f32.mrb[27].mxu1  ;;  %3684 = vst [vmem:[%s4766_s9 + $0x68] sm:$0xff] %v3580_v27  }
 0x3e1   : > { %v3655_v32 = vpack.c.bf16 %v2706_v30, %v2703_v24  ;;  %3683 = vst [vmem:[%s4766_s9 + $0x60] sm:$0xff] %v3575_v31  }
 0x3e2   : > { %3700 = vst [vmem:[%s4766_s9 + $0xe8] sm:$0xff] %v3660_v28  }
 0x3e3   : > { %3699 = vst [vmem:[%s4766_s9 + $0xe0] sm:$0xff] %v3655_v32   ;;  %v3789_v33 = vpop.f32.mrb[28].mxu0 }
 0x3e4   : > { %v2591_v35 = vpop.f32.mrb[29].mxu0 }
 0x3e5   : > { %v3821_v34 = vpop.f32.mrb[28].mxu1  ;;  %v3790_v37 = vpop.f32.mrb[30].mxu0 }
 0x3e6   : > { %v2719_v36 = vpop.f32.mrb[29].mxu1  ;;  %v3590_v39 = vpack.c.bf16 %v3790_v37, %v3789_v33  ;;  %v2594_v42 = vpop.f32.mrb[31].mxu0 }
 0x3e7   : > { %v3822_v38 = vpop.f32.mrb[30].mxu1  ;;  %v3585_v44 = vpack.c.bf16 %v2594_v42, %v2591_v35 }
 0x3e8   : > { %v3670_v41 = vpack.c.bf16 %v3822_v38, %v3821_v34  ;;  %v2722_v43 = vpop.f32.mrb[31].mxu1  ;;  %3686 = vst [vmem:[%s4766_s9 + $0x78] sm:$0xff] %v3590_v39  }
 0x3e9   : > { %v3665_v45 = vpack.c.bf16 %v2722_v43, %v2719_v36  ;;  %3685 = vst [vmem:[%s4766_s9 + $0x70] sm:$0xff] %v3585_v44  }
 0x3ea   : > { %3702 = vst [vmem:[%s4766_s9 + $0xf8] sm:$0xff] %v3670_v41  }
 0x3eb   : > { %3701 = vst [vmem:[%s4766_s9 + $0xf0] sm:$0xff] %v3665_v45  }
 0x3ec PF: > { %s5243_s21 = sld [smem:[#allocation18_spill]]  ;;  %s3511_s25 = sshll.u32 %s4445_s22, 12 }
 0x3ed   : > { %s5244_s10 = sld [smem:[#allocation22_spill]]  ;;  %s3068_s15 = sshll.u32 %s4766_s9, 4  ;;  %s5134_s15 = int_to_ptr.vmem [resolvable:$true] %s3068_s15 }
 0x3ee   : > { %s5138_s18 = scalar_lea.sflag [#allocation5], %s272_s1  ;;  %s4327_s4 = scalar_lea.vmem %s5134_s15, 4096 }
 0x3ef   : > { %p4328_p6 = scmp.ne.s32.totalorder %s5134_s15, %s4327_s4  ;;  %s4470_s22 = smov [#allocation11]  }
 0x3f0   : > { %s4331_s30 = sshll.u32 %s4470_s22, 4  ;;  %s4332_s30 = int_to_ptr.vmem [resolvable:$false] %s4331_s30 }
 0x3f1   : > { %s4333_s27 = scalar_lea.vmem %s4332_s30, 8192  ;;  %p4334_p9 = scmp.lt.s32.totalorder %s5134_s15, %s4332_s30 }
 0x3f2   : > { %p5245_p0 = scmp.ne.s32.totalorder %s5243_s21, 0  ;;  %p4335_p10 = scmp.lt.s32.totalorder %s4333_s27, %s4327_s4 }
 0x3f3   : > { %s5131_s26 = scalar_lea.hbm %s5244_s10, %s3511_s25 }
 0x3f4   : > { %p4329_p7 = pnand %p4328_p6, %p5245_p0  ;;  %p4336_p13 = por %p4335_p10, %p4334_p9 }
 0x3f6   : > { %p4330_p5 = pneg %p4329_p7 }
 0x3f8   : > { %p4337_p2 = pnand %p4336_p13, %p4330_p5 }
 0x3fa   : > { %4340 = shalt.err (!%p4337_p2)
}
 0x3fb   : > { %s4341_s1 = scalar_lea.hbm %s5131_s26, 4096  ;;  %s4345_s29 = scalar_lea.hbm %s5244_s10, 8192 }
 0x3fc   : > { %p4342_p8 = scmp.ne.s32.totalorder %s5131_s26, %s4341_s1  ;;  %p4346_p4 = scmp.lt.u32.totalorder %s5131_s26, %s5244_s10 }
 0x3fd   : > { %p4347_p12 = scmp.lt.u32.totalorder %s4345_s29, %s4341_s1  ;;  %p4349_p6 = scmp.lt.u32.totalorder %s4341_s1, %s5131_s26 }
 0x3fe   : > { %p4343_p11 = pnand %p4342_p8, %p5245_p0 }
 0x3ff   : > { %p4348_p3 = por %p4347_p12, %p4346_p4 }
 0x400   : > { %p4344_p1 = pneg %p4343_p11 }
 0x401   : > { %p4350_p7 = por %p4349_p6, %p4348_p3 }
 0x403   : > { %p4351_p5 = pnand %p4350_p7, %p4344_p1 }
 0x405   : > { %4354 = shalt.err (!%p4351_p5)
}
 0x406   : > { %s4471_s8 = smov 64   ;;  %s4472_s25 = smov 4  }
 0x407   : > { %3853 = dma.vmem_to_hbm [thread:$0]  (%p5245_p0), %s5134_s15, 4096, %s5131_s26, %s5138_s18, %s4471_s8, %s4471_s8, %s4472_s25  }
 0x408 PF: > { %s5246_s12 = sld [smem:[#allocation17_spill]]  ;;  %s5247_s14 = sld [smem:[#allocation16_spill]] }
 0x409   : > { %s5248_s4 = sld [smem:[#allocation19_spill]] }
 0x40e   : > { %p3880_p9 = scmp.ge.s32.totalorder %s5246_s12, 2  ;;  %s3083_s22 = sand.u32 1, %s5247_s14  }
 0x40f   : > { %p5249_p10 = scmp.ne.s32.totalorder %s5248_s4, 0  ;;  %s3084_s30 = scalar_lea.sflag [#allocation5], %s3083_s22 }
 0x411   : > { %p3870_p13 = pnand %p3880_p9, %p5249_p10 }
 0x413   : > { %4412 = dma.done.wait (!%p3870_p13), %s3084_s30, 4096  }
 0x414   : > { %4414 = vsyncadd (!%p3870_p13), %s3084_s30, 4294963200  ;;  %s22_s25 = sadd.s32 1, %s5246_s12   ;;  %s5250_s15 = smov %s4421_s16 }
 0x415   : > { %p19_p2 = scmp.ge.s32.totalorder %s22_s25, 6   ;;  %s5251_s16 = smov %s4425_s17 }
 0x416   : > { %s5252_s17 = smov %s4711_s11  ;;  %s5253_s18 = smov %s4433_s19 }
 0x417   : > { %s5254_s19 = smov %s4437_s20  ;;  %s5255_s20 = smov %s4716_s28 }
 0x418   : > { %s5256_s21 = smov %s4449_s23  ;;  %s5257_s22 = smov %s4453_s24 }
 0x419   : > { %s5258_s23 = smov %s5261_s5  ;;  %s5259_s24 = smov %s5265_s7 }
 0x41a   :  { %21 = sbr.rel (!%p19_p2) target bundleno = 15 (0xf), region = 102 }
 0x421   :  { %3089 = vsyncpa [#allocation4], 1 }
 0x422   :  { %3091 = vsyncpa [#allocation4 + $0x1], 1 }
 0x423   :  { %3092 = vsyncpa [#allocation7], 1 }
 0x424   :  { %3093 = vsyncpa [#allocation10], 1 }
 0x425   :  { %3094 = vsyncpa [#allocation5], 1 }
 0x426   :  { %3096 = vsyncpa [#allocation5 + $0x1], 1 }

</bundles_post_ra>
